<compile_context>
chip_gen: v7x
topology: tpu7x:2x2x1
jax: 0.10.0
libtpu: 0.0.40
codegen_flags: <defaults>
</compile_context>

<pallas_src>
import functools

import jax
import jax.numpy as jnp
from jax import lax
from jax.experimental import pallas as pl
from jax.experimental.pallas import tpu as pltpu


def gra_kernel(x_ref,
               w_proj_ref, b_proj_ref,
               w_gga_ref, w_ggb_ref,
               head_ref,
               w_fc1_ref, b_fc1_ref,
               w_fc2_ref, b_fc2_ref,
               ln_g_ref, ln_b_ref,
               o_ref, *, ic, isp):
    x = x_ref[0]                                                    # (HW, C)

    # ---- fused theta|phi|gx projection (1x1 conv + folded BN + ReLU) -----
    proj = jnp.maximum(
        jnp.dot(x, w_proj_ref[...], preferred_element_type=jnp.float32)
        + b_proj_ref[...], 0.0)                                     # (HW, 3*IC)
    theta = proj[:, :ic]
    phi = proj[:, ic:2 * ic]
    gx = proj[:, 2 * ic:]

    # ---- global spatial relation with G = theta @ phi^T eliminated -------
    #   gg = relu([G, G^T] @ Wgg + b)
    #      = relu(theta @ (phi^T @ Wa) + phi @ (theta^T @ Wb) + b)
    dn = (((0,), (0,)), ((), ()))           # contract the leading (HW) dims
    ma = lax.dot_general(phi, w_gga_ref[...], dn,
                         preferred_element_type=jnp.float32)        # (IC, IS)
    mb = lax.dot_general(theta, w_ggb_ref[...], dn,
                         preferred_element_type=jnp.float32)        # (IC, IS)

    head = head_ref[...]                    # (1, 4 + 2*IS) packed gate params
    b_gg = head[0:1, 4 + isp:4 + 2 * isp]                           # (1, IS)
    gg = jnp.maximum(
        jnp.dot(theta, ma, preferred_element_type=jnp.float32)
        + jnp.dot(phi, mb, preferred_element_type=jnp.float32)
        + b_gg, 0.0)                                                # (HW, IS)

    gmean = jnp.mean(gx, axis=1, keepdims=True)                     # (HW, 1)

    # ---- spatial gate head (NSd == 1): pure VPU, no MXU, no concat --------
    w1_g = head[0:1, 0:1]
    b_w1 = head[0:1, 1:2]
    w2 = head[0:1, 2:3]
    b_w2 = head[0:1, 3:4]
    w1_gg = head[0:1, 4:4 + isp]                                    # (1, IS)
    h1 = jnp.maximum(
        gmean * w1_g + jnp.sum(gg * w1_gg, axis=1, keepdims=True) + b_w1, 0.0)
    wys = h1 * w2 + b_w2                                            # (HW, 1)
    xs = jax.nn.sigmoid(wys) * x                                    # (HW, C)

    # ---- FeedForward + residual + LayerNorm (fused statistics) ------------
    ff = jnp.maximum(
        jnp.dot(xs, w_fc1_ref[...], preferred_element_type=jnp.float32)
        + b_fc1_ref[...], 0.0)                                      # (HW, Dff)
    ff = (jnp.dot(ff, w_fc2_ref[...], preferred_element_type=jnp.float32)
          + b_fc2_ref[...])                                         # (HW, C)
    y = xs + ff
    c = y.shape[1]
    s1 = jnp.sum(y, axis=1, keepdims=True)
    s2 = jnp.sum(y * y, axis=1, keepdims=True)
    mu = s1 * (1.0 / c)
    var = s2 * (1.0 / c) - mu * mu
    y = (y - mu) * lax.rsqrt(var + 1e-5)
    y = y * ln_g_ref[...] + ln_b_ref[...]

    o_ref[0] = y


def _pack_kernel_params(params, hw):
    """Fuse / split module params into the kernel's operand layout."""
    ic = params["w_theta"].shape[1]
    isp = params["w_gg"].shape[1]
    nsd = params["w_ws1"].shape[1]
    # Gate head is specialised for num_channel_s // down_ratio == 1 (this
    # config).  General NSd would fall back to a small matmul.
    assert nsd == 1, "gate head specialised for NSd == 1"

    w_proj = jnp.concatenate(
        [params["w_theta"], params["w_phi"], params["w_gx"]], axis=1)
    b_proj = jnp.concatenate(
        [params["b_theta"], params["b_phi"], params["b_gx"]], axis=1)
    w_gga = params["w_gg"][:hw, :]      # acts on G   (Gs_in channels)
    w_ggb = params["w_gg"][hw:, :]      # acts on G^T (Gs_out channels)
    # packed gate-head params: [w1_g, b_ws1, w_ws2, b_ws2, w1_gg(IS), b_gg(IS)]
    head = jnp.concatenate([
        params["w_ws1"][0:1, 0:1],
        params["b_ws1"][:, 0:1],
        params["w_ws2"][0:1, 0:1],
        params["b_ws2"][:, 0:1],
        params["w_ws1"][1:, 0:1].T,
        params["b_gg"],
    ], axis=1)

    weight_args = [w_proj, b_proj, w_gga, w_ggb, head,
                   params["w_fc1"], params["b_fc1"],
                   params["w_fc2"], params["b_fc2"],
                   params["ln_g"], params["ln_b"]]
    return weight_args, ic, isp


def gra_module_forward(x_nchw, params):
    """x_nchw: (B, C, H, W) float32.  Returns (B, C, H, W)."""
    b, c, h, w = x_nchw.shape
    hw = h * w
    # NCHW -> (B, HW, C): channels on the lane axis (lane-dense for C=128).
    x = jnp.transpose(x_nchw, (0, 2, 3, 1)).reshape(b, hw, c)

    weight_args, ic, isp = _pack_kernel_params(params, hw)

    in_specs = [pl.BlockSpec((1, hw, c), lambda i: (i, 0, 0))]
    in_specs += [pl.BlockSpec(a.shape, lambda i: (0, 0)) for a in weight_args]

    out = pl.pallas_call(
        functools.partial(gra_kernel, ic=ic, isp=isp),
        out_shape=jax.ShapeDtypeStruct((b, hw, c), jnp.float32),
        grid=(b,),
        in_specs=in_specs,
        out_specs=pl.BlockSpec((1, hw, c), lambda i: (i, 0, 0)),
        compiler_params=pltpu.CompilerParams(
            dimension_semantics=("parallel",)),
    )(x, *weight_args)

    # (B, HW, C) -> NCHW
    return jnp.transpose(out.reshape(b, h, w, c), (0, 3, 1, 2))


def gra_module_reference(x_nchw, params):
    """Pure-JAX reference (materializes G, un-fused) for correctness check."""
    b, c, h, w = x_nchw.shape
    hw = h * w
    x = jnp.transpose(x_nchw, (0, 2, 3, 1)).reshape(b, hw, c)

    relu = lambda v: jnp.maximum(v, 0.0)
    theta = relu(x @ params["w_theta"] + params["b_theta"])
    phi = relu(x @ params["w_phi"] + params["b_phi"])
    G = jnp.einsum("bpc,bqc->bpq", theta, phi)
    J = jnp.concatenate([G, jnp.swapaxes(G, 1, 2)], axis=2)
    gg = relu(J @ params["w_gg"] + params["b_gg"])
    gx = relu(x @ params["w_gx"] + params["b_gx"])
    gmean = jnp.mean(gx, axis=2, keepdims=True)
    ys = jnp.concatenate([gmean, gg], axis=2)
    h1 = relu(ys @ params["w_ws1"] + params["b_ws1"])
    wys = h1 @ params["w_ws2"] + params["b_ws2"]
    xs = jax.nn.sigmoid(wys) * x
    ff = relu(xs @ params["w_fc1"] + params["b_fc1"]) @ params["w_fc2"] + params["b_fc2"]
    y = xs + ff
    mu = jnp.mean(y, axis=2, keepdims=True)
    var = jnp.mean((y - mu) ** 2, axis=2, keepdims=True)
    y = (y - mu) * jax.lax.rsqrt(var + 1e-5)
    y = y * params["ln_g"] + params["ln_b"]
    return jnp.transpose(y.reshape(b, h, w, c), (0, 3, 1, 2))


def fold_conv_bn(key, cin, cout):
    """Conv2d(1x1, no bias) + eval-mode BatchNorm folded into (W, b)."""
    k1, k2, k3, k4, k5 = jax.random.split(key, 5)
    w = jax.random.normal(k1, (cin, cout), jnp.float32) * 0.1
    gamma = 1.0 + 0.1 * jax.random.normal(k2, (cout,), jnp.float32)
    beta = 0.1 * jax.random.normal(k3, (cout,), jnp.float32)
    mean = 0.1 * jax.random.normal(k4, (cout,), jnp.float32)
    var = 0.5 + 0.5 * jnp.abs(jax.random.normal(k5, (cout,), jnp.float32))
    scale = gamma * jax.lax.rsqrt(var + 1e-5)
    w_f = w * scale[None, :]
    b_f = beta - mean * scale
    return w_f, b_f.reshape(1, cout)


def make_params(key, in_channel, in_spatial, cha_ratio, spa_ratio, down_ratio,
                d_model, d_ff):
    assert d_model == in_channel, "pwff d_model must equal channel count"
    ic = in_channel // cha_ratio
    isp = in_spatial // spa_ratio
    ncs = 1 + isp
    nsd = ncs // down_ratio

    keys = jax.random.split(key, 12)
    p = {}
    p["w_theta"], p["b_theta"] = fold_conv_bn(keys[0], in_channel, ic)
    p["w_phi"], p["b_phi"] = fold_conv_bn(keys[1], in_channel, ic)
    p["w_gx"], p["b_gx"] = fold_conv_bn(keys[2], in_channel, ic)
    p["w_gg"], p["b_gg"] = fold_conv_bn(keys[3], 2 * in_spatial, isp)
    p["w_ws1"], p["b_ws1"] = fold_conv_bn(keys[4], ncs, nsd)
    p["w_ws2"], p["b_ws2"] = fold_conv_bn(keys[5], nsd, 1)
    # FeedForward (Linear weights) + LayerNorm
    p["w_fc1"] = jax.random.normal(keys[6], (d_model, d_ff), jnp.float32) * 0.05
    p["b_fc1"] = (0.05 * jax.random.normal(keys[7], (d_ff,), jnp.float32)).reshape(1, d_ff)
    p["w_fc2"] = jax.random.normal(keys[8], (d_ff, d_model), jnp.float32) * 0.05
    p["b_fc2"] = (0.05 * jax.random.normal(keys[9], (d_model,), jnp.float32)).reshape(1, d_model)
    p["ln_g"] = (1.0 + 0.1 * jax.random.normal(keys[10], (d_model,), jnp.float32)).reshape(1, d_model)
    p["ln_b"] = (0.1 * jax.random.normal(keys[11], (d_model,), jnp.float32)).reshape(1, d_model)
    return p


if __name__ == "__main__":
    # Module-consistent small shapes; C=128 keeps I/O lane-dense.
    #   in_channel = d_model = 128, spatial 8x8 -> in_spatial = 64
    #   IC = 32, IS = 8, NSd = (1+8)//8 = 1
    B, C, H, W = 2, 128, 8, 8
    HW = H * W
    cha_ratio, spa_ratio, down_ratio = 4, 8, 8
    d_model, d_ff = C, 256

    key = jax.random.PRNGKey(0)
    kx, kp = jax.random.split(key)
    x = jax.random.normal(kx, (B, C, H, W), jnp.float32)
    params = make_params(kp, C, HW, cha_ratio, spa_ratio, down_ratio,
                         d_model, d_ff)

    out = jax.block_until_ready(gra_module_forward(x, params))
    ref = gra_module_reference(x, params)

    assert out.shape == (B, C, H, W)
    # Tolerance slightly loosened: the G-elimination reassociation and the
    # fused LayerNorm statistics change f32 rounding vs the reference.
    assert jnp.allclose(out, ref, atol=2e-3, rtol=2e-3), "mismatch vs reference"

    print("KERNEL_OK")
</pallas_src>

<mosaic_0001>
module attributes {stable_mosaic.version = 11 : i64} {
  func.func @gra_kernel(%arg0: i32, %arg1: memref<1x64x128xf32, #tpu.memory_space<vmem>>, %arg2: memref<128x96xf32, #tpu.memory_space<vmem>>, %arg3: memref<1x96xf32, #tpu.memory_space<vmem>>, %arg4: memref<64x8xf32, #tpu.memory_space<vmem>>, %arg5: memref<64x8xf32, #tpu.memory_space<vmem>>, %arg6: memref<1x20xf32, #tpu.memory_space<vmem>>, %arg7: memref<128x256xf32, #tpu.memory_space<vmem>>, %arg8: memref<1x256xf32, #tpu.memory_space<vmem>>, %arg9: memref<256x128xf32, #tpu.memory_space<vmem>>, %arg10: memref<1x128xf32, #tpu.memory_space<vmem>>, %arg11: memref<1x128xf32, #tpu.memory_space<vmem>>, %arg12: memref<1x128xf32, #tpu.memory_space<vmem>>, %arg13: memref<1x64x128xf32, #tpu.memory_space<vmem>>) attributes {dimension_semantics = [#tpu.dimension_semantics<parallel>], iteration_bounds = array<i64: 2>, scalar_prefetch = 0 : i64, scratch_operands = 0 : i64, tpu.core_type = #tpu.core_type<tc>, window_params = [{transform_indices = @transform_0, window_bounds = array<i64: 1, 64, 128>}, {pipeline_mode = #tpu.pipeline_mode<synchronous>, transform_indices = @transform_1, window_bounds = array<i64: 128, 96>}, {pipeline_mode = #tpu.pipeline_mode<synchronous>, transform_indices = @transform_2, window_bounds = array<i64: 1, 96>}, {pipeline_mode = #tpu.pipeline_mode<synchronous>, transform_indices = @transform_3, window_bounds = array<i64: 64, 8>}, {pipeline_mode = #tpu.pipeline_mode<synchronous>, transform_indices = @transform_4, window_bounds = array<i64: 64, 8>}, {pipeline_mode = #tpu.pipeline_mode<synchronous>, transform_indices = @transform_5, window_bounds = array<i64: 1, 20>}, {pipeline_mode = #tpu.pipeline_mode<synchronous>, transform_indices = @transform_6, window_bounds = array<i64: 128, 256>}, {pipeline_mode = #tpu.pipeline_mode<synchronous>, transform_indices = @transform_7, window_bounds = array<i64: 1, 256>}, {pipeline_mode = #tpu.pipeline_mode<synchronous>, transform_indices = @transform_8, window_bounds = array<i64: 256, 128>}, {pipeline_mode = #tpu.pipeline_mode<synchronous>, transform_indices = @transform_9, window_bounds = array<i64: 1, 128>}, {pipeline_mode = #tpu.pipeline_mode<synchronous>, transform_indices = @transform_10, window_bounds = array<i64: 1, 128>}, {pipeline_mode = #tpu.pipeline_mode<synchronous>, transform_indices = @transform_11, window_bounds = array<i64: 1, 128>}, {transform_indices = @transform_12, window_bounds = array<i64: 1, 64, 128>}]} {
    %c0 = arith.constant 0 : index
    %c0_0 = arith.constant 0 : index
    %c0_1 = arith.constant 0 : index
    %0 = vector.load %arg1[%c0, %c0_0, %c0_1] : memref<1x64x128xf32, #tpu.memory_space<vmem>>, vector<1x64x128xf32>
    %1 = vector.shape_cast %0 : vector<1x64x128xf32> to vector<64x128xf32>
    %c0_2 = arith.constant 0 : index
    %c0_3 = arith.constant 0 : index
    %2 = vector.load %arg2[%c0_2, %c0_3] : memref<128x96xf32, #tpu.memory_space<vmem>>, vector<128x96xf32>
    %cst = arith.constant dense<0.000000e+00> : vector<64x96xf32>
    %3 = tpu.matmul %1, %2, %cst {dimension_numbers = #tpu.dot_dimension_numbers<[1], [0], [0], [1], [0, 0, 1, 1], [], []>} : vector<64x128xf32>, vector<128x96xf32>, vector<64x96xf32> -> vector<64x96xf32>
    %c0_4 = arith.constant 0 : index
    %c0_5 = arith.constant 0 : index
    %4 = vector.load %arg3[%c0_4, %c0_5] : memref<1x96xf32, #tpu.memory_space<vmem>>, vector<1x96xf32>
    %5 = vector.broadcast %4 : vector<1x96xf32> to vector<64x96xf32>
    %6 = arith.addf %3, %5 : vector<64x96xf32>
    %cst_6 = arith.constant 0.000000e+00 : f32
    %7 = vector.broadcast %cst_6 : f32 to vector<64x96xf32>
    %8 = arith.maximumf %6, %7 : vector<64x96xf32>
    %9 = vector.extract_strided_slice %8 {offsets = [0, 0], sizes = [64, 32], strides = [1, 1]} : vector<64x96xf32> to vector<64x32xf32>
    %10 = vector.extract_strided_slice %8 {offsets = [0, 32], sizes = [64, 32], strides = [1, 1]} : vector<64x96xf32> to vector<64x32xf32>
    %11 = vector.extract_strided_slice %8 {offsets = [0, 64], sizes = [64, 32], strides = [1, 1]} : vector<64x96xf32> to vector<64x32xf32>
    %c0_7 = arith.constant 0 : index
    %c0_8 = arith.constant 0 : index
    %12 = vector.load %arg4[%c0_7, %c0_8] : memref<64x8xf32, #tpu.memory_space<vmem>>, vector<64x8xf32>
    %cst_9 = arith.constant dense<0.000000e+00> : vector<32x8xf32>
    %13 = tpu.matmul %10, %12, %cst_9 {dimension_numbers = #tpu.dot_dimension_numbers<[0], [0], [1], [1], [0, 1, 1, 1], [], []>} : vector<64x32xf32>, vector<64x8xf32>, vector<32x8xf32> -> vector<32x8xf32>
    %c0_10 = arith.constant 0 : index
    %c0_11 = arith.constant 0 : index
    %14 = vector.load %arg5[%c0_10, %c0_11] : memref<64x8xf32, #tpu.memory_space<vmem>>, vector<64x8xf32>
    %cst_12 = arith.constant dense<0.000000e+00> : vector<32x8xf32>
    %15 = tpu.matmul %9, %14, %cst_12 {dimension_numbers = #tpu.dot_dimension_numbers<[0], [0], [1], [1], [0, 1, 1, 1], [], []>} : vector<64x32xf32>, vector<64x8xf32>, vector<32x8xf32> -> vector<32x8xf32>
    %c0_13 = arith.constant 0 : index
    %c0_14 = arith.constant 0 : index
    %16 = vector.load %arg6[%c0_13, %c0_14] : memref<1x20xf32, #tpu.memory_space<vmem>>, vector<1x20xf32>
    %17 = vector.extract_strided_slice %16 {offsets = [0, 12], sizes = [1, 8], strides = [1, 1]} : vector<1x20xf32> to vector<1x8xf32>
    %cst_15 = arith.constant dense<0.000000e+00> : vector<64x8xf32>
    %18 = tpu.matmul %9, %13, %cst_15 {dimension_numbers = #tpu.dot_dimension_numbers<[1], [0], [0], [1], [0, 0, 1, 1], [], []>} : vector<64x32xf32>, vector<32x8xf32>, vector<64x8xf32> -> vector<64x8xf32>
    %cst_16 = arith.constant dense<0.000000e+00> : vector<64x8xf32>
    %19 = tpu.matmul %10, %15, %cst_16 {dimension_numbers = #tpu.dot_dimension_numbers<[1], [0], [0], [1], [0, 0, 1, 1], [], []>} : vector<64x32xf32>, vector<32x8xf32>, vector<64x8xf32> -> vector<64x8xf32>
    %20 = arith.addf %18, %19 : vector<64x8xf32>
    %21 = vector.broadcast %17 : vector<1x8xf32> to vector<64x8xf32>
    %22 = arith.addf %20, %21 : vector<64x8xf32>
    %cst_17 = arith.constant 0.000000e+00 : f32
    %23 = vector.broadcast %cst_17 : f32 to vector<64x8xf32>
    %24 = arith.maximumf %22, %23 : vector<64x8xf32>
    %cst_18 = arith.constant dense<0.000000e+00> : vector<64xf32>
    %25 = vector.multi_reduction <add>, %11, %cst_18 [1] : vector<64x32xf32> to vector<64xf32>
    %26 = vector.shape_cast %25 : vector<64xf32> to vector<64x1xf32>
    %cst_19 = arith.constant 3.200000e+01 : f32
    %27 = vector.broadcast %cst_19 : f32 to vector<64x1xf32>
    %28 = arith.divf %26, %27 : vector<64x1xf32>
    %29 = vector.extract_strided_slice %16 {offsets = [0, 0], sizes = [1, 1], strides = [1, 1]} : vector<1x20xf32> to vector<1x1xf32>
    %30 = vector.extract_strided_slice %16 {offsets = [0, 1], sizes = [1, 1], strides = [1, 1]} : vector<1x20xf32> to vector<1x1xf32>
    %31 = vector.extract_strided_slice %16 {offsets = [0, 2], sizes = [1, 1], strides = [1, 1]} : vector<1x20xf32> to vector<1x1xf32>
    %32 = vector.extract_strided_slice %16 {offsets = [0, 3], sizes = [1, 1], strides = [1, 1]} : vector<1x20xf32> to vector<1x1xf32>
    %33 = vector.extract_strided_slice %16 {offsets = [0, 4], sizes = [1, 8], strides = [1, 1]} : vector<1x20xf32> to vector<1x8xf32>
    %34 = vector.broadcast %29 : vector<1x1xf32> to vector<64x1xf32>
    %35 = arith.mulf %28, %34 : vector<64x1xf32>
    %36 = vector.broadcast %33 : vector<1x8xf32> to vector<64x8xf32>
    %37 = arith.mulf %24, %36 : vector<64x8xf32>
    %cst_20 = arith.constant dense<0.000000e+00> : vector<64xf32>
    %38 = vector.multi_reduction <add>, %37, %cst_20 [1] : vector<64x8xf32> to vector<64xf32>
    %39 = vector.shape_cast %38 : vector<64xf32> to vector<64x1xf32>
    %40 = arith.addf %35, %39 : vector<64x1xf32>
    %41 = vector.broadcast %30 : vector<1x1xf32> to vector<64x1xf32>
    %42 = arith.addf %40, %41 : vector<64x1xf32>
    %cst_21 = arith.constant 0.000000e+00 : f32
    %43 = vector.broadcast %cst_21 : f32 to vector<64x1xf32>
    %44 = arith.maximumf %42, %43 : vector<64x1xf32>
    %45 = vector.broadcast %31 : vector<1x1xf32> to vector<64x1xf32>
    %46 = arith.mulf %44, %45 : vector<64x1xf32>
    %47 = vector.broadcast %32 : vector<1x1xf32> to vector<64x1xf32>
    %48 = arith.addf %46, %47 : vector<64x1xf32>
    %49 = arith.negf %48 : vector<64x1xf32>
    %50 = math.exp %49 : vector<64x1xf32>
    %cst_22 = arith.constant 1.000000e+00 : f32
    %51 = vector.broadcast %cst_22 : f32 to vector<64x1xf32>
    %52 = arith.addf %51, %50 : vector<64x1xf32>
    %53 = arith.divf %51, %52 : vector<64x1xf32>
    %54 = vector.broadcast %53 : vector<64x1xf32> to vector<64x128xf32>
    %55 = arith.mulf %54, %1 : vector<64x128xf32>
    %c0_23 = arith.constant 0 : index
    %c0_24 = arith.constant 0 : index
    %56 = vector.load %arg7[%c0_23, %c0_24] : memref<128x256xf32, #tpu.memory_space<vmem>>, vector<128x256xf32>
    %cst_25 = arith.constant dense<0.000000e+00> : vector<64x256xf32>
    %57 = tpu.matmul %55, %56, %cst_25 {dimension_numbers = #tpu.dot_dimension_numbers<[1], [0], [0], [1], [0, 0, 1, 1], [], []>} : vector<64x128xf32>, vector<128x256xf32>, vector<64x256xf32> -> vector<64x256xf32>
    %c0_26 = arith.constant 0 : index
    %c0_27 = arith.constant 0 : index
    %58 = vector.load %arg8[%c0_26, %c0_27] : memref<1x256xf32, #tpu.memory_space<vmem>>, vector<1x256xf32>
    %59 = vector.broadcast %58 : vector<1x256xf32> to vector<64x256xf32>
    %60 = arith.addf %57, %59 : vector<64x256xf32>
    %cst_28 = arith.constant 0.000000e+00 : f32
    %61 = vector.broadcast %cst_28 : f32 to vector<64x256xf32>
    %62 = arith.maximumf %60, %61 : vector<64x256xf32>
    %c0_29 = arith.constant 0 : index
    %c0_30 = arith.constant 0 : index
    %63 = vector.load %arg9[%c0_29, %c0_30] : memref<256x128xf32, #tpu.memory_space<vmem>>, vector<256x128xf32>
    %cst_31 = arith.constant dense<0.000000e+00> : vector<64x128xf32>
    %64 = tpu.matmul %62, %63, %cst_31 {dimension_numbers = #tpu.dot_dimension_numbers<[1], [0], [0], [1], [0, 0, 1, 1], [], []>} : vector<64x256xf32>, vector<256x128xf32>, vector<64x128xf32> -> vector<64x128xf32>
    %c0_32 = arith.constant 0 : index
    %c0_33 = arith.constant 0 : index
    %65 = vector.load %arg10[%c0_32, %c0_33] : memref<1x128xf32, #tpu.memory_space<vmem>>, vector<1x128xf32>
    %66 = vector.broadcast %65 : vector<1x128xf32> to vector<64x128xf32>
    %67 = arith.addf %64, %66 : vector<64x128xf32>
    %68 = arith.addf %55, %67 : vector<64x128xf32>
    %cst_34 = arith.constant dense<0.000000e+00> : vector<64xf32>
    %69 = vector.multi_reduction <add>, %68, %cst_34 [1] : vector<64x128xf32> to vector<64xf32>
    %70 = vector.shape_cast %69 : vector<64xf32> to vector<64x1xf32>
    %71 = arith.mulf %68, %68 : vector<64x128xf32>
    %cst_35 = arith.constant dense<0.000000e+00> : vector<64xf32>
    %72 = vector.multi_reduction <add>, %71, %cst_35 [1] : vector<64x128xf32> to vector<64xf32>
    %73 = vector.shape_cast %72 : vector<64xf32> to vector<64x1xf32>
    %cst_36 = arith.constant 7.812500e-03 : f32
    %74 = vector.broadcast %cst_36 : f32 to vector<64x1xf32>
    %75 = arith.mulf %70, %74 : vector<64x1xf32>
    %cst_37 = arith.constant 7.812500e-03 : f32
    %76 = vector.broadcast %cst_37 : f32 to vector<64x1xf32>
    %77 = arith.mulf %73, %76 : vector<64x1xf32>
    %78 = arith.mulf %75, %75 : vector<64x1xf32>
    %79 = arith.subf %77, %78 : vector<64x1xf32>
    %80 = vector.broadcast %75 : vector<64x1xf32> to vector<64x128xf32>
    %81 = arith.subf %68, %80 : vector<64x128xf32>
    %cst_38 = arith.constant 9.99999974E-6 : f32
    %82 = vector.broadcast %cst_38 : f32 to vector<64x1xf32>
    %83 = arith.addf %79, %82 : vector<64x1xf32>
    %84 = math.rsqrt %83 : vector<64x1xf32>
    %85 = vector.broadcast %84 : vector<64x1xf32> to vector<64x128xf32>
    %86 = arith.mulf %81, %85 : vector<64x128xf32>
    %c0_39 = arith.constant 0 : index
    %c0_40 = arith.constant 0 : index
    %87 = vector.load %arg11[%c0_39, %c0_40] : memref<1x128xf32, #tpu.memory_space<vmem>>, vector<1x128xf32>
    %88 = vector.broadcast %87 : vector<1x128xf32> to vector<64x128xf32>
    %89 = arith.mulf %86, %88 : vector<64x128xf32>
    %c0_41 = arith.constant 0 : index
    %c0_42 = arith.constant 0 : index
    %90 = vector.load %arg12[%c0_41, %c0_42] : memref<1x128xf32, #tpu.memory_space<vmem>>, vector<1x128xf32>
    %91 = vector.broadcast %90 : vector<1x128xf32> to vector<64x128xf32>
    %92 = arith.addf %89, %91 : vector<64x128xf32>
    %c0_43 = arith.constant 0 : index
    %c0_44 = arith.constant 0 : index
    %c0_45 = arith.constant 0 : index
    %93 = vector.load %arg13[%c0_43, %c0_44, %c0_45] : memref<1x64x128xf32, #tpu.memory_space<vmem>>, vector<1x64x128xf32>
    %94 = vector.shape_cast %93 : vector<1x64x128xf32> to vector<64x128xf32>
    %95 = vector.shape_cast %92 : vector<64x128xf32> to vector<1x64x128xf32>
    tpu.vector_store %arg13[%c0_43, %c0_44, %c0_45], %95 {strides = array<i32>} : memref<1x64x128xf32, #tpu.memory_space<vmem>>, vector<1x64x128xf32>,
    return
  }
  func.func @transform_0(%arg0: i32) -> (i32, i32, i32) {
    %c0_i32 = arith.constant 0 : i32
    %c0_i32_0 = arith.constant 0 : i32
    %c0_i32_1 = arith.constant 0 : i32
    return %arg0, %c0_i32, %c0_i32_0 : i32, i32, i32
  }
  func.func @transform_1(%arg0: i32) -> (i32, i32) {
    %c0_i32 = arith.constant 0 : i32
    %c0_i32_0 = arith.constant 0 : i32
    %c0_i32_1 = arith.constant 0 : i32
    return %c0_i32, %c0_i32_0 : i32, i32
  }
  func.func @transform_2(%arg0: i32) -> (i32, i32) {
    %c0_i32 = arith.constant 0 : i32
    %c0_i32_0 = arith.constant 0 : i32
    %c0_i32_1 = arith.constant 0 : i32
    return %c0_i32, %c0_i32_0 : i32, i32
  }
  func.func @transform_3(%arg0: i32) -> (i32, i32) {
    %c0_i32 = arith.constant 0 : i32
    %c0_i32_0 = arith.constant 0 : i32
    %c0_i32_1 = arith.constant 0 : i32
    return %c0_i32, %c0_i32_0 : i32, i32
  }
  func.func @transform_4(%arg0: i32) -> (i32, i32) {
    %c0_i32 = arith.constant 0 : i32
    %c0_i32_0 = arith.constant 0 : i32
    %c0_i32_1 = arith.constant 0 : i32
    return %c0_i32, %c0_i32_0 : i32, i32
  }
  func.func @transform_5(%arg0: i32) -> (i32, i32) {
    %c0_i32 = arith.constant 0 : i32
    %c0_i32_0 = arith.constant 0 : i32
    %c0_i32_1 = arith.constant 0 : i32
    return %c0_i32, %c0_i32_0 : i32, i32
  }
  func.func @transform_6(%arg0: i32) -> (i32, i32) {
    %c0_i32 = arith.constant 0 : i32
    %c0_i32_0 = arith.constant 0 : i32
    %c0_i32_1 = arith.constant 0 : i32
    return %c0_i32, %c0_i32_0 : i32, i32
  }
  func.func @transform_7(%arg0: i32) -> (i32, i32) {
    %c0_i32 = arith.constant 0 : i32
    %c0_i32_0 = arith.constant 0 : i32
    %c0_i32_1 = arith.constant 0 : i32
    return %c0_i32, %c0_i32_0 : i32, i32
  }
  func.func @transform_8(%arg0: i32) -> (i32, i32) {
    %c0_i32 = arith.constant 0 : i32
    %c0_i32_0 = arith.constant 0 : i32
    %c0_i32_1 = arith.constant 0 : i32
    return %c0_i32, %c0_i32_0 : i32, i32
  }
  func.func @transform_9(%arg0: i32) -> (i32, i32) {
    %c0_i32 = arith.constant 0 : i32
    %c0_i32_0 = arith.constant 0 : i32
    %c0_i32_1 = arith.constant 0 : i32
    return %c0_i32, %c0_i32_0 : i32, i32
  }
  func.func @transform_10(%arg0: i32) -> (i32, i32) {
    %c0_i32 = arith.constant 0 : i32
    %c0_i32_0 = arith.constant 0 : i32
    %c0_i32_1 = arith.constant 0 : i32
    return %c0_i32, %c0_i32_0 : i32, i32
  }
  func.func @transform_11(%arg0: i32) -> (i32, i32) {
    %c0_i32 = arith.constant 0 : i32
    %c0_i32_0 = arith.constant 0 : i32
    %c0_i32_1 = arith.constant 0 : i32
    return %c0_i32, %c0_i32_0 : i32, i32
  }
  func.func @transform_12(%arg0: i32) -> (i32, i32, i32) {
    %c0_i32 = arith.constant 0 : i32
    %c0_i32_0 = arith.constant 0 : i32
    %c0_i32_1 = arith.constant 0 : i32
    return %arg0, %c0_i32, %c0_i32_0 : i32, i32, i32
  }
}

</mosaic_0001>

<bundles_post_ra>
// kernel: tpu_custom_call.1
= control target key start
LH: loop header
LB: loop body
LE: loop exit
PB: predicated region body
PF: predicated region fallthrough
CT: control target
= control target key end

     0   :  { %s3413_s0 = inlined_call_operand.vmem [shape: f32[2,64,128], index: 0, kind: input, shape index: {}]   ;;  %s3414_s1 = inlined_call_operand.vmem [shape: f32[128,96], index: 1, kind: input, shape index: {}]   ;;  %s3415_s2 = inlined_call_operand.vmem [shape: f32[1,96], index: 2, kind: input, shape index: {}]   ;;  %s3416_s3 = inlined_call_operand.vmem [shape: f32[64,8], index: 3, kind: input, shape index: {}]   ;;  %s3417_s4 = inlined_call_operand.vmem [shape: f32[64,8], index: 4, kind: input, shape index: {}]   ;;  %s3418_s5 = inlined_call_operand.vmem [shape: f32[1,20], index: 5, kind: input, shape index: {}]   ;;  %s3419_s6 = inlined_call_operand.vmem [shape: f32[128,256], index: 6, kind: input, shape index: {}]   ;;  %s3420_s7 = inlined_call_operand.vmem [shape: f32[1,256], index: 7, kind: input, shape index: {}]   ;;  %s3421_s8 = inlined_call_operand.hbm [shape: f32[256,128], index: 8, kind: input, shape index: {}]   ;;  %s3422_s9 = inlined_call_operand.vmem [shape: f32[1,128], index: 9, kind: input, shape index: {}]   ;;  %s3423_s10 = inlined_call_operand.vmem [shape: f32[1,128], index: 10, kind: input, shape index: {}]   ;;  %s3424_s11 = inlined_call_operand.vmem [shape: f32[1,128], index: 11, kind: input, shape index: {}]   ;;  %s3425_s12 = inlined_call_operand.hbm [shape: f32[2,64,128], index: 12, kind: output, shape index: {}]  }
   0x1   :  { %3430 = sst [smem:[#allocation10_spill]] %s3421_s8 }
   0x2   :  { %17 = vsyncpa [#allocation3], 0 }
   0x3   :  { %18 = vsyncpa [#allocation4], 0 }
   0x4   :  { %20 = vsyncpa [#allocation4 + $0x1], 0  ;;  %s2722_s21 = smov 0   ;;  %s2724_s22 = smov 0  }
   0x5   :  { %s2726_s23 = smov 0   ;;  %s2728_s24 = smov 0  }
   0x6 LB: > { %3431 = sst [smem:[#allocation8_spill]] %s2636_s23  ;;  %s2743_s25 = sadd.s32 4294967295, %s2640_s24   ;;  %s2640_s24 = sphi %s2728_s24, %s3447_s24   ;;  %s2636_s23 = sphi %s2726_s23, %s3444_s23   ;;  %s2632_s22 = sphi %s2724_s22, %s3446_s22   ;;  %s2628_s21 = sphi %s2722_s21, %s3445_s21  }
   0x7   : > { %s1948_s26 = sadd.s32 4294967294, %s2640_s24   ;;  %s2747_s27 = sadd.s32 1, %s2640_s24  }
   0x8   : > { %s290_s28 = sadd.s32 1, %s2636_s23  ;;  %s287_s29 = ssub.s32 %s2640_s24, %s2747_s27 }
   0x9   : > { %p300_p0 = scmp.ne.s32.totalorder %s2636_s23, %s2632_s22  ;;  %p288_p1 = scmp.eq.s32.totalorder %s287_s29, 0 }
   0xa   : > { %p301_p2 = scmp.eq.s32.totalorder %s2743_s25, 1  ;;  %p306_p3 = scmp.ne.s32.totalorder %s2632_s22, %s2628_s21 }
   0xb   : > { %p307_p4 = scmp.eq.s32.totalorder %s1948_s26, 1  ;;  %p1949_p7 = scmp.ge.s32.totalorder %s2640_s24, 1 }
   0xc   : > { %s2758_s30 = scalar_select %p288_p1, %s2636_s23, %s290_s28  }
   0xd   : > { %p2760_p5 = por %p301_p2, %p300_p0  ;;  %p2764_p6 = por %p307_p4, %p306_p3 }
   0xe   : > { %3432 = sst [smem:[#allocation9_spill]] %s2758_s30  ;;  %p314_p8 = scmp.lt.s32.totalorder %s2640_s24, 3 }
   0xf   : > { %s3433_s13 = scalar_select %p2760_p5, 1, 0 }
  0x10   : > { %s3434_s14 = scalar_select %p2764_p6, 1, 0 }
  0x11   : > { %p3427_p9 = scmp.eq.s32.totalorder %s2743_s25, 0  ;;  %p2771_p10 = pnand %p1949_p7, %p314_p8 }
  0x12   : > { %s2642_s16 = smov [#allocation2]   ;;  %s3437_s8 = sld [smem:[#allocation10_spill]] }
  0x13   : > { %s3435_s15 = scalar_select %p2771_p10, 1, 0 }
  0x14   : > { %s347_s17 = sshll.u32 %s2642_s16, 4  ;;  %p2431_p11 = pneg %p2771_p10  ;;  %s348_s17 = int_to_ptr.vmem [resolvable:$true] %s347_s17 }
  0x16   : > { %p2779_p12 = pnand %p3427_p9, %p2431_p11 }
  0x18   : > { %s2546_s26 = scalar_lea.hbm %s3437_s8, 4096  ;;  %p2548_p0 = pneg %p2779_p12 }
  0x19   : > { %p2547_p13 = scmp.ne.s32.totalorder %s3437_s8, %s2546_s26  ;;  %p2553_p3 = scmp.lt.u32.totalorder %s2546_s26, %s3437_s8 }
  0x1b   : > { %p2549_p1 = pnand %p2548_p0, %p2547_p13 }
  0x1d   : > { %p2550_p2 = pneg %p2549_p1 }
  0x1f   : > { %p2555_p4 = pnand %p2553_p3, %p2550_p2 }
  0x21   : > { %2558 = shalt.err (!%p2555_p4)
}
  0x22   : > { %s2559_s23 = scalar_lea.vmem %s348_s17, 4096  ;;  %p2567_p9 = scmp.lt.s32.totalorder %s348_s17, %s348_s17 }
  0x23   : > { %p2560_p7 = scmp.ne.s32.totalorder %s348_s17, %s2559_s23  ;;  %p2568_p6 = scmp.lt.s32.totalorder %s2559_s23, %s2559_s23 }
  0x25   : > { %p2562_p8 = pnand %p2560_p7, %p2548_p0  ;;  %p2569_p5 = por %p2568_p6, %p2567_p9 }
  0x27   : > { %p2563_p11 = pneg %p2562_p8 }
  0x29   : > { %p2570_p10 = pnand %p2569_p5, %p2563_p11 }
  0x2b   : > { %2573 = shalt.err (!%p2570_p10)
}
  0x2c   : > { %s2643_s19 = smov 128   ;;  %s2644_s20 = smov 8  }
  0x2d   : > { %2434 = dma.hbm_to_vmem [thread:$0]  (!%p2779_p12), %s3437_s8, 4096, %s348_s17, [#allocation3], %s2643_s19, %s2643_s19, %s2644_s20  }
  0x2e   : > { %p3438_p13 = scmp.ne.s32.totalorder %s3435_s15, 0 }
  0x2f   : > { %p3439_p1 = scmp.eq.s32.totalorder (!%p3438_p13), %s2743_s25, 0 }
  0x30   : > { %380 = sbr.rel (%p3438_p13) target bundleno = 2032 (0x7f0), region = 68 }
  0x37   : > { %2619 = dma.done.wait (%p3439_p1), [#allocation3], 4096   ;;  %p3440_p0 = pmov %p3439_p1 }
  0x38   : > { %p422_p5 = scmp.lt.s32.totalorder %s2743_s25, 1  ;;  %v435_v0 = vld [vmem:[%s3414_s1] sm:$0xff]  ;;  %v436_v1 = vld [vmem:[%s3414_s1 + $0x8] sm:$0xff]  ;;  %v437_v2 = vld [vmem:[%s3414_s1 + $0x10] sm:$0xff]  ;;  %s2645_s15 = smov 96   ;;  %vm879_vm0 = vcmask 261120  }
  0x39   : > { %2621 = vsyncadd (%p3440_p0), [#allocation3], 4294963200  ;;  %v2257_v3 = vpack.c.bf16 %v436_v1, %v435_v0  ;;  %v438_v4 = vld [vmem:[%s3414_s1 + $0x18] sm:$0xff]  ;;  %v439_v6 = vld [vmem:[%s3414_s1 + $0x20] sm:$0xff]  ;;  %s2647_s20 = smov 116   ;;  %s2648_s28 = smov 124  }
  0x3a   : > { %s423_s23 = scalar_select %p422_p5, %s2743_s25, 1  ;;  %v2261_v5 = vpack.c.bf16 %v438_v4, %v437_v2  ;;  %v440_v7 = vld [vmem:[%s3414_s1 + $0x28] sm:$0xff]  ;;  %v441_v10 = vld [vmem:[%s3414_s1 + $0x30] sm:$0xff]  ;;  %v442_v11 = vld [vmem:[%s3414_s1 + $0x38] sm:$0xff]  ;;  %vm643_vm1 = vcmask 523264   ;;  %vm1223_vm2 = vcmask 64512  }
  0x3b   : > { %2258 = vmatprep.subr.bf16.mxu0 %v2257_v3  ;;  %v2265_v8 = vpack.c.bf16 %v440_v7, %v439_v6  ;;  %v2269_v12 = vpack.c.bf16 %v442_v11, %v441_v10  ;;  %v443_v13 = vld [vmem:[%s3414_s1 + $0x40] sm:$0xff]  ;;  %v444_v14 = vld [vmem:[%s3414_s1 + $0x48] sm:$0xff]  ;;  %v445_v16 = vld [vmem:[%s3414_s1 + $0x50] sm:$0xff]  ;;  %s2649_s29 = smov 127   ;;  %s2651_s26 = smov 126  }
  0x3c   : > { %s1999_s30 = sshll.u32 %s423_s23, 6  ;;  %2260 = vmatpush3.bf16.msra.mxu0 %v2257_v3  ;;  %v2273_v15 = vpack.c.bf16 %v444_v14, %v443_v13  ;;  %v446_v17 = vld [vmem:[%s3414_s1 + $0x58] sm:$0xff]  ;;  %v447_v19 = vld [vmem:[%s3414_s1 + $0x60] sm:$0xff]  ;;  %v448_v20 = vld [vmem:[%s3414_s1 + $0x68] sm:$0xff]  ;;  %s2646_s23 = smov 64  }
  0x3d   : > { %s2828_s8 = scalar_lea.vmem %s3413_s0, %s1999_s30  ;;  %2262 = vmatprep.subr.bf16.mxu0 %v2261_v5  ;;  %v2277_v18 = vpack.c.bf16 %v446_v17, %v445_v16  ;;  %v2281_v21 = vpack.c.bf16 %v448_v20, %v447_v19  ;;  %v449_v22 = vld [vmem:[%s3414_s1 + $0x70] sm:$0xff]  ;;  %v450_v23 = vld [vmem:[%s3414_s1 + $0x78] sm:$0xff]  ;;  %v1957_v32 = vld [vmem:[%s3415_s2] ss:$0 sm:$0xff]  ;;  %s419_s16 = sand.u32 1, %s2632_s22  }
  0x3e   : > { %v427_v9 = vld [vmem:[%s2828_s8] sm:$0xff]  ;;  %v2285_v24 = vpack.c.bf16 %v450_v23, %v449_v22  ;;  %v428_v25 = vld [vmem:[%s2828_s8 + $0x8] sm:$0xff]  ;;  %v429_v26 = vld [vmem:[%s2828_s8 + $0x10] sm:$0xff]  ;;  %s1954_s19 = sshll.u32 %s419_s16, 6  ;;  %s3372_s17 = scalar_lea.sflag [#allocation4], %s419_s16 }
  0x3f   : > { %2161 = vmatprep.mubr.f32.mxu0 %v427_v9  ;;  %v430_v27 = vld [vmem:[%s2828_s8 + $0x18] sm:$0xff]  ;;  %v431_v28 = vld [vmem:[%s2828_s8 + $0x20] sm:$0xff]  ;;  %v432_v29 = vld [vmem:[%s2828_s8 + $0x28] sm:$0xff]  ;;  %s3331_s30 = scalar_lea.vmem [#allocation5], %s1954_s19  ;;  %p3441_p9 = scmp.ne.s32.totalorder %s3433_s13, 0 }
  0x40   : > { %2264 = vmatpush3.bf16.msra.mxu0 %v2261_v5  ;;  %v433_v30 = vld [vmem:[%s2828_s8 + $0x30] sm:$0xff]  ;;  %v434_v31 = vld [vmem:[%s2828_s8 + $0x38] sm:$0xff]  ;;  %v571_v57 = vld [vmem:[%s3416_s3] sm:$0xff] }
  0x41   : > { %2266 = vmatprep.subr.bf16.mxu0 %v2265_v8  ;;  %v572_v58 = vld [vmem:[%s3416_s3 + $0x8] sm:$0xff]  ;;  %v573_v60 = vld [vmem:[%s3416_s3 + $0x10] sm:$0xff]  ;;  %v574_v61 = vld [vmem:[%s3416_s3 + $0x18] sm:$0xff] }
  0x42   : > { %v2289_v59 = vpack.c.bf16 %v572_v58, %v571_v57  ;;  %v2293_v62 = vpack.c.bf16 %v574_v61, %v573_v60  ;;  %v575_v63 = vld [vmem:[%s3416_s3 + $0x20] sm:$0xff]  ;;  %v576_v0 = vld [vmem:[%s3416_s3 + $0x28] sm:$0xff]  ;;  %v577_v2 = vld [vmem:[%s3416_s3 + $0x30] sm:$0xff] }
  0x43   : > { %v2297_v1 = vpack.c.bf16 %v576_v0, %v575_v63  ;;  %v578_v3 = vld [vmem:[%s3416_s3 + $0x38] sm:$0xff]  ;;  %v741_v6 = vld [vmem:[%s3417_s4] sm:$0xff]  ;;  %v742_v7 = vld [vmem:[%s3417_s4 + $0x8] sm:$0xff] }
  0x44   : > { %2268 = vmatpush3.bf16.msra.mxu0 %v2265_v8  ;;  %2290 = vmatprep.subr.bf16.mxu1 %v2289_v59  ;;  %v2301_v4 = vpack.c.bf16 %v578_v3, %v577_v2  ;;  %v2305_v8 = vpack.c.bf16 %v742_v7, %v741_v6  ;;  %v2970_v16 = vld [vmem:[%s3418_s5] ss:$0 sm:$0xff] }
  0x45   : > { %2270 = vmatprep.subr.bf16.mxu0 %v2269_v12  ;;  %2292 = vmatpush3.bf16.msra.mxu1 %v2289_v59 }
  0x46   : > { %2294 = vmatprep.subr.bf16.mxu1 %v2293_v62 }
  0x48   : > { %2272 = vmatpush3.bf16.msra.mxu0 %v2269_v12 }
  0x49   : > { %2274 = vmatprep.subr.bf16.mxu0 %v2273_v15  ;;  %2296 = vmatpush3.bf16.msra.mxu1 %v2293_v62 }
  0x4a   : > { %2298 = vmatprep.subr.bf16.mxu1 %v2297_v1 }
  0x4c   : > { %2276 = vmatpush3.bf16.msra.mxu0 %v2273_v15 }
  0x4d   : > { %2278 = vmatprep.subr.bf16.mxu0 %v2277_v18  ;;  %2300 = vmatpush3.bf16.msra.mxu1 %v2297_v1 }
  0x4e   : > { %2302 = vmatprep.subr.bf16.mxu1 %v2301_v4 }
  0x50   : > { %2280 = vmatpush3.bf16.msra.mxu0 %v2277_v18 }
  0x51   : > { %2282 = vmatprep.subr.bf16.mxu0 %v2281_v21  ;;  %2304 = vmatpush3.bf16.msra.mxu1 %v2301_v4 }
  0x52   : > { %2306 = vmatprep.subr.bf16.mxu1 %v2305_v8 }
  0x54   : > { %2284 = vmatpush3.bf16.msra.mxu0 %v2281_v21 }
  0x55   : > { %2286 = vmatprep.subr.bf16.mxu0 %v2285_v24 }
  0x58   : > { %2288 = vmatpush3.bf16.msra.mxu0 %v2285_v24 }
  0x5b   : > { %2162 = vmatmul.mubr.f32.vlgmr.msra.gmra.mrb[0].mxu0 %v428_v25 }
  0x5c   : > { %2164 = vmatprep.mubr.f32.mxu0 %v429_v26  ;;  %v743_v26 = vld [vmem:[%s3417_s4 + $0x10] sm:$0xff] }
  0x5f   : > { %2165 = vmatmul.mubr.f32.gmra.mrb[2].mxu0 %v430_v27  ;;  %v744_v27 = vld [vmem:[%s3417_s4 + $0x18] sm:$0xff] }
  0x60   : > { %2167 = vmatprep.mubr.f32.mxu0 %v431_v28  ;;  %v2309_v28 = vpack.c.bf16 %v744_v27, %v743_v26 }
  0x63   : > { %2168 = vmatmul.mubr.f32.gmra.mrb[4].mxu0 %v432_v29 }
  0x64   : > { %2170 = vmatprep.mubr.f32.mxu0 %v433_v30  ;;  %v745_v30 = vld [vmem:[%s3417_s4 + $0x20] sm:$0xff] }
  0x67   : > { %2171 = vmatmul.mubr.f32.gmra.mrb[6].mxu0 %v434_v31  ;;  %v746_v31 = vld [vmem:[%s3417_s4 + $0x28] sm:$0xff] }
 0x12e   : > { %v2163_v33 = vpop.f32.mrb[0].mxu0 }
 0x12f   : > { %v524_v34 = vpop.f32.mrb[1].mxu0  ;;  %v530_v36 = vadd.f32 %v2163_v33, %v1957_v32 }
 0x130   : > { %v525_v35 = vadd.f32 %v1957_v32, %v524_v34  ;;  %v747_v34 = vld [vmem:[%s3417_s4 + $0x30] sm:$0xff] }
 0x131   : > { %v2874_v42 = vmax.f32 %v530_v36, 0.0 }
 0x132   : > { %v2871_v37 = vmax.f32 %v525_v35, 0.0  ;;  %v2166_v38 = vpop.f32.mrb[2].mxu0  ;;  %v748_v35 = vld [vmem:[%s3417_s4 + $0x38] sm:$0xff] }
 0x133   : > { %v534_v39 = vpop.f32.mrb[3].mxu0  ;;  %v540_v40 = vadd.f32 %v2166_v38, %v1957_v32  ;;  %v2317_v36 = vpack.c.bf16 %v748_v35, %v747_v34 }
 0x134   : > { %v535_v41 = vadd.f32 %v1957_v32, %v534_v39  ;;  %587 = vrot.lane.b32.xlu0 %v2871_v37, %s2645_s15 }
 0x135   : > { %v2878_v46 = vmax.f32 %v540_v40, 0.0 }
 0x136   : > { %v2876_v43 = vmax.f32 %v535_v41, 0.0  ;;  %v2169_v44 = vpop.f32.mrb[4].mxu0 }
 0x137   : > { %v544_v45 = vpop.f32.mrb[5].mxu0  ;;  %v550_v47 = vadd.f32 %v2169_v44, %v1957_v32 }
 0x138   : > { %591 = vrot.lane.b32.xlu1 %v2876_v43, %s2645_s15  ;;  %589 = vrot.lane.b32.xlu0 %v2874_v42, %s2645_s15  ;;  %v545_v48 = vadd.f32 %v1957_v32, %v544_v45 }
 0x139   : > { %v2884_v52 = vmax.f32 %v550_v47, 0.0 }
 0x13a   : > { %v2882_v49 = vmax.f32 %v545_v48, 0.0  ;;  %v2172_v50 = vpop.f32.mrb[6].mxu0 }
 0x13b   : > { %v554_v51 = vpop.f32.mrb[7].mxu0  ;;  %v560_v53 = vadd.f32 %v2172_v50, %v1957_v32 }
 0x13c   : > { %593 = vrot.lane.b32.xlu1 %v2878_v46, %s2645_s15  ;;  %595 = vrot.lane.b32.xlu0 %v2882_v49, %s2645_s15  ;;  %v555_v54 = vadd.f32 %v1957_v32, %v554_v51  ;;  %v2313_v32 = vpack.c.bf16 %v746_v31, %v745_v30 }
 0x13d   : > { %v2890_v56 = vmax.f32 %v560_v53, 0.0 }
 0x13e   : > { %v2888_v55 = vmax.f32 %v555_v54, 0.0 }
 0x140   : > { %597 = vrot.lane.b32.xlu1 %v2884_v52, %s2645_s15  ;;  %599 = vrot.lane.b32.xlu0 %v2888_v55, %s2645_s15 }
 0x144   : > { %601 = vrot.lane.b32.xlu1 %v2890_v56, %s2645_s15  ;;  %s2654_s15 = smov [#allocation5]  }
 0x145   : > { %s2578_s19 = sshll.u32 %s2654_s15, 4  ;;  %s2579_s19 = int_to_ptr.vmem [resolvable:$false] %s2578_s19 }
 0x16d   : > { %749 = vxpose.xlu1.b32.start [1/8] (short) (narrow) %v2871_v37, 32 }
 0x171   : > { %750 = vxpose.xlu1.b32.cont [2/8] (short) (narrow) %v2874_v42, 32 }
 0x175   : > { %751 = vxpose.xlu1.b32.cont [3/8] (short) (narrow) %v2876_v43, 32 }
 0x179   : > { %752 = vxpose.xlu1.b32.cont [4/8] (short) (narrow) %v2878_v46, 32 }
 0x17d   : > { %753 = vxpose.xlu1.b32.cont [5/8] (short) (narrow) %v2882_v49, 32 }
 0x181   : > { %754 = vxpose.xlu1.b32.cont [6/8] (short) (narrow) %v2884_v52, 32 }
 0x185   : > { %755 = vxpose.xlu1.b32.cont [7/8] (short) (narrow) %v2888_v55, 32 }
 0x189   : > { %756 = vxpose.xlu1.b32.end [8/8] (short) (narrow) %v2890_v56, 32 }
 0x1a6   : > { %v2927_v5 = vpop.permute.xlu0 %587 }
 0x1a7   : > { %1146 = vrot.lane.b32.xlu1 %v2871_v37, %s2646_s23  ;;  %611 = vxpose.xlu0.b32.start [1/8] (short) (narrow) %v2927_v5, 32 }
 0x1aa   : > { %v2938_v9 = vpop.permute.xlu0 %589  ;;  %v2943_v10 = vpop.permute.xlu1 %591 }
 0x1ab   : > { %1148 = vrot.lane.b32.xlu1 %v2874_v42, %s2646_s23  ;;  %612 = vxpose.xlu0.b32.cont [2/8] (short) (narrow) %v2938_v9, 32 }
 0x1ae   : > { %v2948_v11 = vpop.permute.xlu1 %593  ;;  %v2953_v12 = vpop.permute.xlu0 %595 }
 0x1af   : > { %1152 = vrot.lane.b32.xlu1 %v2878_v46, %s2646_s23  ;;  %613 = vxpose.xlu0.b32.cont [3/8] (short) (narrow) %v2943_v10, 32 }
 0x1b2   : > { %v2958_v13 = vpop.permute.xlu1 %597  ;;  %v2961_v14 = vpop.permute.xlu0 %599 }
 0x1b3   : > { %1156 = vrot.lane.b32.xlu1 %v2884_v52, %s2646_s23  ;;  %614 = vxpose.xlu0.b32.cont [4/8] (short) (narrow) %v2948_v11, 32 }
 0x1b6   : > { %v2964_v15 = vpop.permute.xlu1 %601 }
 0x1b7   : > { %1160 = vrot.lane.b32.xlu1 %v2890_v56, %s2646_s23  ;;  %615 = vxpose.xlu0.b32.cont [5/8] (short) (narrow) %v2953_v12, 32 }
 0x1bb   : > { %616 = vxpose.xlu0.b32.cont [6/8] (short) (narrow) %v2958_v13, 32 }
 0x1bf   : > { %617 = vxpose.xlu0.b32.cont [7/8] (short) (narrow) %v2961_v14, 32 }
 0x1c3   : > { %618 = vxpose.xlu0.b32.end [8/8] (short) (narrow) %v2964_v15, 32 }
 0x1ec   : > { %1127 = vrot.lane.b32.xlu0 %v2970_v16, %s2647_s20  ;;  %s2580_s20 = scalar_lea.vmem %s2579_s19, 2048 }
 0x1ed   : > { %v765_v17 = vpop.trf.xlu1 }
 0x1f0   : > { %1212 = vrot.lane.b32.xlu0 %v2970_v16, %s2648_s28 }
 0x1f1   : > { %v766_v18 = vpop.trf.xlu1 }
 0x1f4   : > { %1150 = vrot.lane.b32.xlu0 %v2876_v43, %s2646_s23 }
 0x1f5   : > { %v767_v19 = vpop.trf.xlu1 }
 0x1f8   : > { %1154 = vrot.lane.b32.xlu0 %v2882_v49, %s2646_s23 }
 0x1f9   : > { %v768_v20 = vpop.trf.xlu1 }
 0x1fc   : > { %1158 = vrot.lane.b32.xlu0 %v2888_v55, %s2646_s23  ;;  %s2650_s23 = smov 125  }
 0x219   : > { %v1147_v21 = vpop.permute.xlu1 %1146 }
 0x21a   : > { %v1170_v22 = vsel %vm879_vm0, %v1147_v21, 0.0 }
 0x21b   : > { %1171 = vadd.xlane.f32.xlu0 %v1170_v22 }
 0x21d   : > { %v1149_v23 = vpop.permute.xlu1 %1148 }
 0x21e   : > { %v1173_v24 = vsel %vm879_vm0, %v1149_v23, 0.0 }
 0x21f   : > { %1174 = vadd.xlane.f32.xlu1 %v1173_v24 }
 0x221   : > { %v1153_v45 = vpop.permute.xlu1 %1152 }
 0x222   : > { %v1179_v48 = vsel %vm879_vm0, %v1153_v45, 0.0 }
 0x225   : > { %v1157_v54 = vpop.permute.xlu1 %1156 }
 0x226   : > { %v1185_v57 = vsel %vm879_vm0, %v1157_v54, 0.0  ;;  %v1395_v54 = vld [vmem:[%s3419_s6 + $0x10] sm:$0xff] }
 0x227   : > { %v627_v25 = vpop.trf.xlu0 }
 0x228   : > { %2189 = vmatprep.mubr.msk.f32.mxu1 %vm643_vm1, %v627_v25 }
 0x22b   : > { %v628_v29 = vpop.trf.xlu0 }
 0x22c   : > { %2190 = vmatmul.mubr.msk.f32.vlgmr.msra.gmra.mrb[0].mxu1 %vm643_vm1, %v628_v29 }
 0x22d   : > { %2308 = vmatpush3.bf16.msra.mxu1 %v2305_v8 }
 0x22e   : > { %2310 = vmatprep.subr.bf16.mxu1 %v2309_v28 }
 0x22f   : > { %v629_v33 = vpop.trf.xlu0 }
 0x230   : > { %2192 = vmatprep.mubr.msk.f32.mxu1 %vm643_vm1, %v629_v33 }
 0x231   : > { %2312 = vmatpush3.bf16.msra.mxu1 %v2309_v28 }
 0x232   : > { %2314 = vmatprep.subr.bf16.mxu1 %v2313_v32 }
 0x233   : > { %v630_v38 = vpop.trf.xlu0 }
 0x234   : > { %2193 = vmatmul.mubr.msk.f32.gmra.mrb[2].mxu1 %vm643_vm1, %v630_v38 }
 0x235   : > { %2316 = vmatpush3.bf16.msra.mxu1 %v2313_v32  ;;  %2211 = vmatprep.mubr.msk.f32.mxu1 %vm643_vm1, %v765_v17 }
 0x236   : > { %2318 = vmatprep.subr.bf16.mxu1 %v2317_v36 }
 0x239   : > { %2320 = vmatpush3.bf16.msra.mxu1 %v2317_v36  ;;  %v2652_v36 = vmov 0  }
 0x23a   : > { %2489 = vset.pattern.permute.xlu1 %v2652_v36  ;;  %2488 = vset.pattern.permute.xlu0 %v2652_v36 }
 0x23c   : > { %2212 = vmatmul.mubr.msk.f32.vlgmr.msra.gmra.mrb[4].mxu1 %vm643_vm1, %v766_v18 }
 0x23d   : > { %2214 = vmatprep.mubr.msk.f32.mxu1 %vm643_vm1, %v767_v19 }
 0x240   : > { %2215 = vmatmul.mubr.msk.f32.gmra.mrb[6].mxu1 %vm643_vm1, %v768_v20 }
 0x241   : > { %2225 = vmatprep.mubr.msk.f32.mxu1 %vm879_vm0, %v2927_v5 }
 0x25e   : > { %v3010_v39 = vpop.permute.xlu0 %1127 }
 0x262   : > { %v3012_v40 = vpop.permute.xlu0 %1212 }
 0x266   : > { %v1151_v41 = vpop.permute.xlu0 %1150 }
 0x267   : > { %v1176_v44 = vsel %vm879_vm0, %v1151_v41, 0.0  ;;  %v1161_v41 = vpop.permute.xlu1 %1160 }
 0x268   : > { %1177 = vadd.xlane.f32.xlu0 %v1176_v44  ;;  %v1191_v44 = vsel %vm879_vm0, %v1161_v41, 0.0  ;;  %v1421_v41 = vld [vmem:[%s3419_s6 + $0xe0] sm:$0xff] }
 0x26a   : > { %v1155_v47 = vpop.permute.xlu0 %1154 }
 0x26b   : > { %v1182_v51 = vsel %vm879_vm0, %v1155_v47, 0.0 }
 0x26c   : > { %1180 = vadd.xlane.f32.xlu0 %v1179_v48 }
 0x26e   : > { %v1159_v50 = vpop.permute.xlu0 %1158 }
 0x26f   : > { %v1188_v53 = vsel %vm879_vm0, %v1159_v50, 0.0 }
 0x270   : > { %1183 = vadd.xlane.f32.xlu0 %v1182_v51  ;;  %1189 = vadd.xlane.f32.xlu1 %v1188_v53  ;;  %v1396_v51 = vld [vmem:[%s3419_s6 + $0x18] sm:$0xff] }
 0x274   : > { %1186 = vadd.xlane.f32.xlu0 %v1185_v57  ;;  %v1398_v57 = vld [vmem:[%s3419_s6 + $0x28] sm:$0xff] }
 0x28a   : > { %1256 = vrot.lane.b32.xlu0 %v2970_v16, %s2649_s29  ;;  %s2000_s29 = sshll.u32 %s2743_s25, 10 }
 0x28b   : > { %s3364_s18 = scalar_lea.hbm %s3425_s12, %s2000_s29 }
 0x2a8   : > { %v3077_v48 = vpop.xlane.xlu0 %1171 }
 0x2f5   : > { %v3079_v50 = vpop.xlane.xlu0 %1177 }
 0x2ff   : > { %v2191_v58 = vpop.f32.mrb[0].mxu1 }
 0x300   : > { %v722_v59 = vpop.f32.mrb[1].mxu1 }
 0x301   : > { %v2329_v60 = vpack.c.bf16 %v2191_v58, %v722_v59  ;;  %v1400_v58 = vld [vmem:[%s3419_s6 + $0x38] sm:$0xff] }
 0x307   : > { %v2194_v61 = vpop.f32.mrb[2].mxu1 }
 0x308   : > { %v732_v62 = vpop.f32.mrb[3].mxu1 }
 0x309   : > { %v2333_v63 = vpack.c.bf16 %v2194_v61, %v732_v62  ;;  %v1397_v61 = vld [vmem:[%s3419_s6 + $0x20] sm:$0xff]  ;;  %v1399_v62 = vld [vmem:[%s3419_s6 + $0x30] sm:$0xff] }
 0x30f   : > { %v2213_v0 = vpop.f32.mrb[4].mxu1 }
 0x310   : > { %v859_v1 = vpop.f32.mrb[5].mxu1 }
 0x311   : > { %v2321_v2 = vpack.c.bf16 %v2213_v0, %v859_v1  ;;  %v1404_v0 = vld [vmem:[%s3419_s6 + $0x58] sm:$0xff]  ;;  %v2343_v1 = vpack.c.bf16 %v1399_v62, %v1397_v61 }
 0x313   : > { %v2216_v3 = vpop.f32.mrb[6].mxu1  ;;  %2322 = vmatprep.subr.bf16.mxu1 %v2321_v2 }
 0x314   : > { %v869_v4 = vpop.f32.mrb[7].mxu1  ;;  %2324 = vmatpush3.bf16.msra.mxu1 %v2321_v2 }
 0x315   : > { %v2325_v5 = vpack.c.bf16 %v2216_v3, %v869_v4  ;;  %v1401_v3 = vld [vmem:[%s3419_s6 + $0x40] sm:$0xff]  ;;  %v1403_v4 = vld [vmem:[%s3419_s6 + $0x50] sm:$0xff] }
 0x317   : > { %2326 = vmatprep.subr.bf16.mxu1 %v2325_v5 }
 0x318   : > { %2328 = vmatpush3.bf16.msra.mxu1 %v2325_v5  ;;  %v1181_v5 = vpop.xlane.xlu0 %1180 }
 0x319   : > { %2330 = vmatprep.subr.bf16.mxu1 %v2329_v60 }
 0x31b   : > { %2226 = vmatmul.mubr.msk.f32.vlgmr.msra.gmra.mrb[8].mxu1 %vm879_vm0, %v2938_v9 }
 0x31c   : > { %2228 = vmatprep.mubr.msk.f32.mxu1 %vm879_vm0, %v2943_v10  ;;  %2332 = vmatpush3.bf16.msra.mxu1 %v2329_v60  ;;  %v2341_v60 = vpack.c.bf16 %v1400_v58, %v1398_v57 }
 0x31d   : > { %2334 = vmatprep.subr.bf16.mxu1 %v2333_v63 }
 0x31f   : > { %2229 = vmatmul.mubr.msk.f32.gmra.mrb[10].mxu1 %vm879_vm0, %v2948_v11 }
 0x320   : > { %2231 = vmatprep.mubr.msk.f32.mxu1 %vm879_vm0, %v2953_v12  ;;  %2336 = vmatpush3.bf16.msra.mxu1 %v2333_v63  ;;  %v1402_v63 = vld [vmem:[%s3419_s6 + $0x48] sm:$0xff] }
 0x321   : > { %v2345_v2 = vpack.c.bf16 %v1404_v0, %v1402_v63 }
 0x323   : > { %2232 = vmatmul.mubr.msk.f32.gmra.mrb[12].mxu1 %vm879_vm0, %v2958_v13 }
 0x324   : > { %2234 = vmatprep.mubr.msk.f32.mxu1 %vm879_vm0, %v2961_v14 }
 0x327   : > { %2235 = vmatmul.mubr.msk.f32.gmra.mrb[14].mxu1 %vm879_vm0, %v2964_v15 }
 0x328   : > { %2245 = vmatprep.mubr.msk.f32.mxu1 %vm879_vm0, %v2871_v37 }
 0x32b   : > { %2246 = vmatmul.mubr.msk.f32.vlgmr.msra.gmra.mrb[8].mxu1 %vm879_vm0, %v2874_v42 }
 0x32c   : > { %2248 = vmatprep.mubr.msk.f32.mxu1 %vm879_vm0, %v2876_v43 }
 0x32f   : > { %2249 = vmatmul.mubr.msk.f32.gmra.mrb[10].mxu1 %vm879_vm0, %v2878_v46 }
 0x330   : > { %2251 = vmatprep.mubr.msk.f32.mxu1 %vm879_vm0, %v2882_v49 }
 0x333   : > { %2252 = vmatmul.mubr.msk.f32.gmra.mrb[12].mxu1 %vm879_vm0, %v2884_v52 }
 0x334   : > { %2254 = vmatprep.mubr.msk.f32.mxu1 %vm879_vm0, %v2888_v55 }
 0x337   : > { %2255 = vmatmul.mubr.msk.f32.gmra.mrb[14].mxu1 %vm879_vm0, %v2890_v56 }
 0x3fe   : > { %v2247_v37 = vpop.f32.mrb[8].mxu1 }
 0x3ff   : > { %v1131_v42 = vadd.f32 %v2247_v37, %v3010_v39  ;;  %v1083_v6 = vpop.f32.mrb[9].mxu1  ;;  %v1406_v37 = vld [vmem:[%s3419_s6 + $0x68] sm:$0xff] }
 0x400   : > { %v1130_v43 = vadd.f32 %v3010_v39, %v1083_v6  ;;  %v2347_v6 = vpack.c.bf16 %v1403_v4, %v1401_v3 }
 0x401   : > { %v1139_v7 = vmax.f32 %v1131_v42, 0.0  ;;  %v1408_v42 = vld [vmem:[%s3419_s6 + $0x78] sm:$0xff] }
 0x402   : > { %v1138_v46 = vmax.f32 %v1130_v43, 0.0  ;;  %v2250_v8 = vpop.f32.mrb[10].mxu1  ;;  %v2349_v43 = vpack.c.bf16 %v1408_v42, %v1406_v37 }
 0x403   : > { %v1133_v49 = vadd.f32 %v2250_v8, %v3010_v39  ;;  %v1093_v9 = vpop.f32.mrb[11].mxu1  ;;  %v1216_v52 = vmul.f32 %v3012_v40, %v1139_v7  ;;  %v1405_v7 = vld [vmem:[%s3419_s6 + $0x60] sm:$0xff]  ;;  %v1175_v8 = vpop.xlane.xlu1 %1174 }
 0x404   : > { %v1132_v55 = vadd.f32 %v3010_v39, %v1093_v9  ;;  %v1215_v10 = vmul.f32 %v3012_v40, %v1138_v46  ;;  %v1407_v46 = vld [vmem:[%s3419_s6 + $0x70] sm:$0xff]  ;;  %v1412_v9 = vld [vmem:[%s3419_s6 + $0x98] sm:$0xff] }
 0x405   : > { %v1141_v56 = vmax.f32 %v1133_v49, 0.0  ;;  %v1227_v11 = vsel %vm1223_vm2, %v1216_v52, 0.0  ;;  %v1410_v49 = vld [vmem:[%s3419_s6 + $0x88] sm:$0xff]  ;;  %v1184_v52 = vpop.xlane.xlu0 %1183 }
 0x406   : > { %v1140_v12 = vmax.f32 %v1132_v55, 0.0  ;;  %v2253_v13 = vpop.f32.mrb[12].mxu1  ;;  %1228 = vadd.xlane.f32.xlu1 %v1227_v11  ;;  %v1224_v14 = vsel %vm1223_vm2, %v1215_v10, 0.0  ;;  %v2351_v55 = vpack.c.bf16 %v1407_v46, %v1405_v7  ;;  %v2353_v10 = vpack.c.bf16 %v1412_v9, %v1410_v49  ;;  %v1411_v11 = vld [vmem:[%s3419_s6 + $0x90] sm:$0xff] }
 0x407   : > { %v1135_v15 = vadd.f32 %v2253_v13, %v3010_v39  ;;  %v1103_v17 = vpop.f32.mrb[13].mxu1  ;;  %1225 = vadd.xlane.f32.xlu0 %v1224_v14  ;;  %v1218_v18 = vmul.f32 %v3012_v40, %v1141_v56  ;;  %v1409_v56 = vld [vmem:[%s3419_s6 + $0x80] sm:$0xff]  ;;  %v1414_v13 = vld [vmem:[%s3419_s6 + $0xa8] sm:$0xff]  ;;  %v1416_v14 = vld [vmem:[%s3419_s6 + $0xb8] sm:$0xff] }
 0x408   : > { %v1134_v20 = vadd.f32 %v3010_v39, %v1103_v17  ;;  %v1217_v22 = vmul.f32 %v3012_v40, %v1140_v12  ;;  %v3141_v12 = vpop.xlane.xlu1 %1189  ;;  %v2357_v17 = vpack.c.bf16 %v1416_v14, %v1414_v13 }
 0x409   : > { %v1143_v19 = vmax.f32 %v1135_v15, 0.0  ;;  %v1233_v21 = vsel %vm1223_vm2, %v1218_v18, 0.0  ;;  %v2355_v15 = vpack.c.bf16 %v1411_v11, %v1409_v56  ;;  %v1413_v18 = vld [vmem:[%s3419_s6 + $0xa0] sm:$0xff] }
 0x40a   : > { %v2256_v23 = vpop.f32.mrb[14].mxu1  ;;  %1234 = vadd.xlane.f32.xlu1 %v1233_v21  ;;  %v1142_v26 = vmax.f32 %v1134_v20, 0.0  ;;  %v1230_v27 = vsel %vm1223_vm2, %v1217_v22, 0.0  ;;  %v1187_v20 = vpop.xlane.xlu0 %1186  ;;  %v1418_v22 = vld [vmem:[%s3419_s6 + $0xc8] sm:$0xff] }
 0x40b   : > { %v1113_v24 = vpop.f32.mrb[15].mxu1  ;;  %v1220_v28 = vmul.f32 %v3012_v40, %v1143_v19  ;;  %v1137_v35 = vadd.f32 %v2256_v23, %v3010_v39  ;;  %v1415_v19 = vld [vmem:[%s3419_s6 + $0xb0] sm:$0xff]  ;;  %v1420_v23 = vld [vmem:[%s3419_s6 + $0xd8] sm:$0xff] }
 0x40c   : > { %v1136_v25 = vadd.f32 %v3010_v39, %v1113_v24  ;;  %v1219_v32 = vmul.f32 %v3012_v40, %v1142_v26  ;;  %v1394_v39 = vld [vmem:[%s3419_s6 + $0x8] sm:$0xff]  ;;  %v2359_v24 = vpack.c.bf16 %v1415_v19, %v1413_v18  ;;  %v1417_v26 = vld [vmem:[%s3419_s6 + $0xc0] sm:$0xff] }
 0x40d   : > { %v1239_v31 = vsel %vm1223_vm2, %v1220_v28, 0.0  ;;  %v1145_v38 = vmax.f32 %v1137_v35, 0.0  ;;  %v2337_v53 = vpack.c.bf16 %v1396_v51, %v1394_v39  ;;  %v1198_v35 = vmul.f32 0.03125, %v1181_v5 }
 0x40e   : > { %v1144_v29 = vmax.f32 %v1136_v25, 0.0  ;;  %1231 = vadd.xlane.f32.xlu1 %v1230_v27  ;;  %v1236_v34 = vsel %vm1223_vm2, %v1219_v32, 0.0  ;;  %v2361_v25 = vpack.c.bf16 %v1420_v23, %v1418_v22  ;;  %v1419_v27 = vld [vmem:[%s3419_s6 + $0xd0] sm:$0xff]  ;;  %v3167_v28 = vpop.permute.xlu0 %1256  ;;  %v1195_v32 = vmul.f32 0.03125, %v3077_v48 }
 0x40f   : > { %v1222_v45 = vmul.f32 %v3012_v40, %v1145_v38  ;;  %2338 = vmatprep.subr.bf16.mxu0 %v2337_v53  ;;  %v2363_v36 = vpack.c.bf16 %v1419_v27, %v1417_v26  ;;  %v1200_v51 = vmul.f32 0.03125, %v1187_v20 }
 0x410   : > { %v1221_v30 = vmul.f32 %v3012_v40, %v1144_v29  ;;  %v1393_v40 = vld [vmem:[%s3419_s6] sm:$0xff]  ;;  %v1204_v39 = vmul.f32 %v2970_v16, %v1195_v32 }
 0x411   : > { %v1245_v47 = vsel %vm1223_vm2, %v1222_v45, 0.0  ;;  %v2339_v59 = vpack.c.bf16 %v1395_v54, %v1393_v40  ;;  %v1207_v40 = vmul.f32 %v2970_v16, %v1198_v35  ;;  %v1199_v54 = vmul.f32 0.03125, %v1184_v52 }
 0x412   : > { %1240 = vadd.xlane.f32.xlu1 %v1239_v31  ;;  %v1242_v33 = vsel %vm1223_vm2, %v1221_v30, 0.0  ;;  %v1422_v30 = vld [vmem:[%s3419_s6 + $0xe8] sm:$0xff]  ;;  %v1424_v31 = vld [vmem:[%s3419_s6 + $0xf8] sm:$0xff]  ;;  %v1209_v62 = vmul.f32 %v2970_v16, %v1200_v51 }
 0x413   : > { %2340 = vmatpush1.bf16.msra.mxu0 %v2339_v59  ;;  %v2365_v38 = vpack.c.bf16 %v1424_v31, %v1422_v30 }
 0x414   : > { %2342 = vmatprep.subr.bf16.mxu0 %v2341_v60 }
 0x416   : > { %1237 = vadd.xlane.f32.xlu1 %v1236_v34  ;;  %v1197_v34 = vmul.f32 0.03125, %v3079_v50 }
 0x417   : > { %2344 = vmatpush1.bf16.msra.mxu0 %v2343_v1 }
 0x418   : > { %2346 = vmatprep.subr.bf16.mxu0 %v2345_v2  ;;  %v1206_v50 = vmul.f32 %v2970_v16, %v1197_v34  ;;  %v1208_v2 = vmul.f32 %v2970_v16, %v1199_v54 }
 0x41b   : > { %2348 = vmatpush1.bf16.msra.mxu0 %v2347_v6 }
 0x41c   : > { %2350 = vmatprep.subr.bf16.mxu0 %v2349_v43 }
 0x41d   : > { %1286 = vrot.lane.b32.xlu0 %v2970_v16, %s2650_s23 }
 0x41f   : > { %2352 = vmatpush1.bf16.msra.mxu0 %v2351_v55 }
 0x420   : > { %2354 = vmatprep.subr.bf16.mxu0 %v2353_v10 }
 0x423   : > { %2356 = vmatpush1.bf16.msra.mxu0 %v2355_v15 }
 0x424   : > { %2358 = vmatprep.subr.bf16.mxu0 %v2357_v17 }
 0x427   : > { %1275 = vrot.lane.b32.xlu1 %v2970_v16, %s2651_s26  ;;  %2360 = vmatpush1.bf16.msra.mxu0 %v2359_v24 }
 0x428   : > { %2362 = vmatprep.subr.bf16.mxu0 %v2361_v25 }
 0x42b   : > { %2364 = vmatpush1.bf16.msra.mxu0 %v2363_v36 }
 0x42c   : > { %2366 = vmatprep.subr.bf16.mxu0 %v2365_v38 }
 0x43c   : > { %1192 = vadd.xlane.f32.xlu0 %v1191_v44  ;;  %v1423_v44 = vld [vmem:[%s3419_s6 + $0xf0] sm:$0xff] }
 0x43d   : > { %v2367_v53 = vpack.c.bf16 %v1423_v44, %v1421_v41 }
 0x43f   : > { %2368 = vmatpush1.bf16.msra.mxu0 %v2367_v53 }
 0x440   : > { %1246 = vadd.xlane.f32.xlu0 %v1245_v47 }
 0x44b   : > { %1243 = vadd.xlane.f32.xlu1 %v1242_v33  ;;  %v1196_v33 = vmul.f32 0.03125, %v1175_v8 }
 0x44d   : > { %v1205_v48 = vmul.f32 %v2970_v16, %v1196_v33 }
 0x493   : > { %v1229_v21 = vpop.xlane.xlu1 %1228 }
 0x494   : > { %v1226_v45 = vpop.xlane.xlu0 %1225  ;;  %v1249_v57 = vadd.f32 %v1229_v21, %v1205_v48 }
 0x495   : > { %v1248_v58 = vadd.f32 %v1226_v45, %v1204_v39 }
 0x496   : > { %v1260_v63 = vadd.f32 %v3167_v28, %v1249_v57 }
 0x497   : > { %v1235_v29 = vpop.xlane.xlu1 %1234  ;;  %v1259_v0 = vadd.f32 %v3167_v28, %v1248_v58 }
 0x498   : > { %v1251_v60 = vadd.f32 %v1235_v29, %v1207_v40  ;;  %v1268_v42 = vmax.f32 %v1260_v63, 0.0  ;;  %v3200_v56 = vpop.permute.xlu0 %1286 }
 0x499   : > { %v1267_v6 = vmax.f32 %v1259_v0, 0.0 }
 0x49a   : > { %v1262_v3 = vadd.f32 %v3167_v28, %v1251_v60 }
 0x49b   : > { %v1232_v47 = vpop.xlane.xlu1 %1231 }
 0x49c   : > { %v1250_v59 = vadd.f32 %v1232_v47, %v1206_v50  ;;  %v1270_v46 = vmax.f32 %v1262_v3, 0.0  ;;  %v2653_v50 = vmov 0.0  }
 0x49d   : > { %1501 = vmatprep.mubr.f32.mxu0 %v2653_v50 }
 0x49e   : > { %v1261_v1 = vadd.f32 %v3167_v28, %v1250_v59 }
 0x49f   : > { %v1241_v61 = vpop.xlane.xlu1 %1240 }
 0x4a0   : > { %v1253_v4 = vadd.f32 %v1241_v61, %v1209_v62  ;;  %v1269_v43 = vmax.f32 %v1261_v1, 0.0  ;;  %v1201_v62 = vmul.f32 0.03125, %v3141_v12 }
 0x4a2   : > { %v1264_v8 = vadd.f32 %v3167_v28, %v1253_v4  ;;  %v1210_v1 = vmul.f32 %v2970_v16, %v1201_v62  ;;  %v2539_v62 = vld [vmem:[%s2828_s8 + $0x8] sm:$0xff] }
 0x4a3   : > { %v1238_v5 = vpop.xlane.xlu1 %1237 }
 0x4a4   : > { %v1252_v37 = vadd.f32 %v1238_v5, %v1208_v2  ;;  %v1272_v17 = vmax.f32 %v1264_v8, 0.0 }
 0x4a6   : > { %v1263_v7 = vadd.f32 %v3167_v28, %v1252_v37 }
 0x4a7   : > { %v3195_v49 = vpop.permute.xlu1 %1275 }
 0x4a8   : > { %v1271_v9 = vmax.f32 %v1263_v7, 0.0  ;;  %v1278_v52 = vmul.f32 %v3195_v49, %v1267_v6  ;;  %v1279_v55 = vmul.f32 %v3195_v49, %v1268_v42  ;;  %v1280_v10 = vmul.f32 %v3195_v49, %v1269_v43 }
 0x4a9   : > { %v1281_v11 = vmul.f32 %v3195_v49, %v1270_v46  ;;  %v1283_v23 = vmul.f32 %v3195_v49, %v1272_v17 }
 0x4aa   : > { %v1289_v13 = vadd.f32 %v3200_v56, %v1278_v52  ;;  %v1290_v14 = vadd.f32 %v3200_v56, %v1279_v55  ;;  %v1291_v15 = vadd.f32 %v3200_v56, %v1280_v10  ;;  %v1282_v18 = vmul.f32 %v3195_v49, %v1271_v9  ;;  %v1582_v55 = vld [vmem:[#allocation2 + $0x80] sm:$0xff]  ;;  %v1583_v10 = vld [vmem:[#allocation2 + $0x88] sm:$0xff] }
 0x4ab   : > { %v1292_v19 = vadd.f32 %v3200_v56, %v1281_v11  ;;  %v1294_v26 = vadd.f32 %v3200_v56, %v1283_v23  ;;  %v1566_v11 = vld [vmem:[#allocation2] sm:$0xff] }
 0x4ac   : > { %v1983_v20 = vmul.f32 -1.442695, %v1289_v13  ;;  %v1984_v21 = vmul.f32 -1.442695, %v1290_v14  ;;  %v1985_v22 = vmul.f32 -1.442695, %v1291_v15  ;;  %v1293_v24 = vadd.f32 %v3200_v56, %v1282_v18 }
 0x4ad   : > { %v1986_v25 = vmul.f32 -1.442695, %v1292_v19  ;;  %v1988_v29 = vmul.f32 -1.442695, %v1294_v26  ;;  %v1567_v13 = vld [vmem:[#allocation2 + $0x8] sm:$0xff]  ;;  %v1584_v14 = vld [vmem:[#allocation2 + $0x90] sm:$0xff] }
 0x4ae   : > { %2490 = vpow2.f32 %v1983_v20  ;;  %v1987_v27 = vmul.f32 -1.442695, %v1293_v24  ;;  %v2371_v15 = vpack.c.bf16 %v1567_v13, %v1566_v11  ;;  %v1568_v18 = vld [vmem:[#allocation2 + $0x10] sm:$0xff]  ;;  %v1569_v19 = vld [vmem:[#allocation2 + $0x18] sm:$0xff]  ;;  %v1586_v20 = vld [vmem:[#allocation2 + $0xa0] sm:$0xff] }
 0x4af   : > { %2492 = vpow2.f32 %v1984_v21  ;;  %v1587_v21 = vld [vmem:[#allocation2 + $0xa8] sm:$0xff]  ;;  %v1570_v24 = vld [vmem:[#allocation2 + $0x20] sm:$0xff]  ;;  %v1588_v26 = vld [vmem:[#allocation2 + $0xb0] sm:$0xff] }
 0x4b0   : > { %2494 = vpow2.f32 %v1985_v22  ;;  %v2375_v22 = vpack.c.bf16 %v1569_v19, %v1568_v18  ;;  %v2377_v23 = vpack.c.bf16 %v1587_v21, %v1586_v20  ;;  %v1597_v13 = vld [vmem:[#allocation2 + $0xf8] sm:$0xff]  ;;  %v1425_v20 = vld [vmem:[%s3420_s7] sm:$0x3] }
 0x4b1   : > { %2496 = vpow2.f32 %v1986_v25  ;;  %v1571_v25 = vld [vmem:[#allocation2 + $0x28] sm:$0xff] }
 0x4b2   : > { %2498 = vpow2.f32 %v1987_v27  ;;  %v1589_v27 = vld [vmem:[#allocation2 + $0xb8] sm:$0xff] }
 0x4b3   : > { %2500 = vpow2.f32 %v1988_v29  ;;  %v2379_v29 = vpack.c.bf16 %v1571_v25, %v1570_v24 }
 0x4b8   : > { %v2491_v30 = vpop.eup %2490 }
 0x4b9   : > { %v2493_v31 = vpop.eup %2492  ;;  %v1321_v32 = vadd.f32 1.0, %v2491_v30  ;;  %v2381_v30 = vpack.c.bf16 %v1589_v27, %v1588_v26 }
 0x4ba   : > { %v2495_v33 = vpop.eup %2494  ;;  %v1322_v34 = vadd.f32 1.0, %v2493_v31  ;;  %v1572_v31 = vld [vmem:[#allocation2 + $0x30] sm:$0xff] }
 0x4bb   : > { %2502 = vrcp.f32 %v1321_v32  ;;  %v1323_v35 = vadd.f32 1.0, %v2495_v33  ;;  %v2497_v36 = vpop.eup %2496  ;;  %v1573_v32 = vld [vmem:[#allocation2 + $0x38] sm:$0xff]  ;;  %v1590_v33 = vld [vmem:[#allocation2 + $0xc0] sm:$0xff] }
 0x4bc   : > { %2504 = vrcp.f32 %v1322_v34  ;;  %v1324_v38 = vadd.f32 1.0, %v2497_v36  ;;  %v2499_v41 = vpop.eup %2498  ;;  %v1591_v34 = vld [vmem:[#allocation2 + $0xc8] sm:$0xff] }
 0x4bd   : > { %2506 = vrcp.f32 %v1323_v35  ;;  %v2501_v44 = vpop.eup %2500  ;;  %v1325_v45 = vadd.f32 1.0, %v2499_v41  ;;  %v2383_v35 = vpack.c.bf16 %v1573_v32, %v1572_v31  ;;  %v2385_v36 = vpack.c.bf16 %v1591_v34, %v1590_v33  ;;  %v1575_v41 = vld [vmem:[#allocation2 + $0x48] sm:$0xff] }
 0x4be   : > { %2508 = vrcp.f32 %v1324_v38  ;;  %v1326_v39 = vadd.f32 1.0, %v2501_v44  ;;  %v1574_v38 = vld [vmem:[#allocation2 + $0x40] sm:$0xff]  ;;  %v1592_v44 = vld [vmem:[#allocation2 + $0xd0] sm:$0xff] }
 0x4bf   : > { %2510 = vrcp.f32 %v1325_v45  ;;  %v1593_v45 = vld [vmem:[#allocation2 + $0xd8] sm:$0xff] }
 0x4c0   : > { %2512 = vrcp.f32 %v1326_v39  ;;  %v1576_v39 = vld [vmem:[#allocation2 + $0x50] sm:$0xff] }
 0x4c5   : > { %v2503_v47 = vpop.eup %2502 }
 0x4c6   : > { %v2505_v48 = vpop.eup %2504  ;;  %1347 = vperm.xlu0 %2488, %v2503_v47   ;;  %v2387_v47 = vpack.c.bf16 %v1575_v41, %v1574_v38 }
 0x4c7   : > { %1352 = vperm.xlu1 %2489, %v2505_v48   ;;  %v2507_v40 = vpop.eup %2506  ;;  %v2389_v48 = vpack.c.bf16 %v1593_v45, %v1592_v44 }
 0x4c8   : > { %v2509_v58 = vpop.eup %2508 }
 0x4c9   : > { %v1193_v51 = vpop.xlane.xlu0 %1192  ;;  %v2511_v61 = vpop.eup %2510 }
 0x4ca   : > { %v1202_v53 = vmul.f32 0.03125, %v1193_v51  ;;  %v2513_v0 = vpop.eup %2512  ;;  %v1577_v51 = vld [vmem:[#allocation2 + $0x58] sm:$0xff] }
 0x4cb   : > { %1357 = vperm.xlu1 %2489, %v2507_v40   ;;  %v1594_v40 = vld [vmem:[#allocation2 + $0xe0] sm:$0xff] }
 0x4cc   : > { %v1211_v54 = vmul.f32 %v2970_v16, %v1202_v53  ;;  %v1595_v53 = vld [vmem:[#allocation2 + $0xe8] sm:$0xff] }
 0x4cd   : > { %v1247_v57 = vpop.xlane.xlu0 %1246 }
 0x4ce   : > { %v1255_v59 = vadd.f32 %v1247_v57, %v1211_v54  ;;  %v2391_v54 = vpack.c.bf16 %v1577_v51, %v1576_v39  ;;  %v2393_v57 = vpack.c.bf16 %v1595_v53, %v1594_v40 }
 0x4cf   : > { %1362 = vperm.xlu1 %2489, %v2509_v58  }
 0x4d0   : > { %v1266_v60 = vadd.f32 %v3167_v28, %v1255_v59 }
 0x4d2   : > { %v1274_v63 = vmax.f32 %v1266_v60, 0.0  ;;  %v2538_v60 = vld [vmem:[%s2828_s8] sm:$0xff] }
 0x4d3   : > { %1367 = vperm.xlu1 %2489, %v2511_v61  }
 0x4d4   : > { %v1285_v2 = vmul.f32 %v3195_v49, %v1274_v63 }
 0x4d6   : > { %v1296_v37 = vadd.f32 %v3200_v56, %v1285_v2 }
 0x4d7   : > { %1372 = vperm.xlu1 %2489, %v2513_v0  }
 0x4d8   : > { %v1244_v3 = vpop.xlane.xlu1 %1243  ;;  %v1990_v43 = vmul.f32 -1.442695, %v1296_v37 }
 0x4d9   : > { %v1254_v4 = vadd.f32 %v1244_v3, %v1210_v1  ;;  %v2540_v1 = vld [vmem:[%s2828_s8 + $0x10] sm:$0xff] }
 0x4da   : > { %2514 = vpow2.f32 %v1990_v43 }
 0x4db   : > { %v1265_v5 = vadd.f32 %v3167_v28, %v1254_v4  ;;  %v2541_v4 = vld [vmem:[%s2828_s8 + $0x18] sm:$0xff] }
 0x4dd   : > { %v1273_v42 = vmax.f32 %v1265_v5, 0.0 }
 0x4df   : > { %v1284_v6 = vmul.f32 %v3195_v49, %v1273_v42  ;;  %v2369_v49 = vpack.c.bf16 %v1583_v10, %v1582_v55  ;;  %v2542_v42 = vld [vmem:[%s2828_s8 + $0x20] sm:$0xff]  ;;  %v1579_v10 = vld [vmem:[#allocation2 + $0x68] sm:$0xff] }
 0x4e0   : > { %v1578_v55 = vld [vmem:[#allocation2 + $0x60] sm:$0xff] }
 0x4e1   : > { %v1295_v12 = vadd.f32 %v3200_v56, %v1284_v6  ;;  %v1585_v56 = vld [vmem:[#allocation2 + $0x98] sm:$0xff]  ;;  %2370 = vmatprep.subr.bf16.mxu0 %v2369_v49  ;;  %2401 = vmatprep.subr.bf16.mxu1 %v2369_v49  ;;  %v2395_v11 = vpack.c.bf16 %v1579_v10, %v1578_v55  ;;  %v1596_v49 = vld [vmem:[#allocation2 + $0xf0] sm:$0xff] }
 0x4e2   : > { %v2373_v17 = vpack.c.bf16 %v1585_v56, %v1584_v14  ;;  %2409 = vmatpush3.bf16.msra.mxu1 %v2371_v15  ;;  %v2397_v14 = vpack.c.bf16 %v1597_v13, %v1596_v49  ;;  %v1580_v56 = vld [vmem:[#allocation2 + $0x70] sm:$0xff] }
 0x4e3   : > { %v1989_v7 = vmul.f32 -1.442695, %v1295_v12  ;;  %v2543_v12 = vld [vmem:[%s2828_s8 + $0x28] sm:$0xff] }
 0x4e4   : > { %v2515_v46 = vpop.eup %2514  ;;  %2402 = vmatprep.subr.bf16.mxu1 %v2373_v17 }
 0x4e5   : > { %2516 = vpow2.f32 %v1989_v7  ;;  %v1328_v9 = vadd.f32 1.0, %v2515_v46 }
 0x4e6   : > { %2410 = vmatpush3.bf16.msra.mxu1 %v2375_v22 }
 0x4e7   : > { %2403 = vmatprep.subr.bf16.mxu1 %v2377_v23 }
 0x4ea   : > { %2411 = vmatpush3.bf16.msra.mxu1 %v2379_v29 }
 0x4eb   : > { %2404 = vmatprep.subr.bf16.mxu1 %v2381_v30 }
 0x4ee   : > { %2412 = vmatpush3.bf16.msra.mxu1 %v2383_v35 }
 0x4ef   : > { %v2517_v8 = vpop.eup %2516  ;;  %2405 = vmatprep.subr.bf16.mxu1 %v2385_v36 }
 0x4f0   : > { %v1327_v16 = vadd.f32 1.0, %v2517_v8  ;;  %v2544_v8 = vld [vmem:[%s2828_s8 + $0x30] sm:$0xff] }
 0x4f2   : > { %2518 = vrcp.f32 %v1327_v16  ;;  %2413 = vmatpush3.bf16.msra.mxu1 %v2387_v47 }
 0x4f3   : > { %2520 = vrcp.f32 %v1328_v9  ;;  %2406 = vmatprep.subr.bf16.mxu1 %v2389_v48 }
 0x4f6   : > { %2414 = vmatpush3.bf16.msra.mxu1 %v2391_v54 }
 0x4f7   : > { %2407 = vmatprep.subr.bf16.mxu1 %v2393_v57 }
 0x4fa   : > { %2415 = vmatpush3.bf16.msra.mxu1 %v2395_v11 }
 0x4fb   : > { %2408 = vmatprep.subr.bf16.mxu1 %v2397_v14 }
 0x4fc   : > { %v2519_v52 = vpop.eup %2518 }
 0x4fd   : > { %1377 = vperm.xlu1 %2489, %v2519_v52   ;;  %v2521_v28 = vpop.eup %2520  ;;  %v2545_v52 = vld [vmem:[%s2828_s8 + $0x38] sm:$0xff]  ;;  %s1874_s8 = sshll.u32 %s3331_s30, 4  ;;  %s3366_s8 = int_to_ptr.vmem [resolvable:$true] %s1874_s8 }
 0x4fe   : > { %s2574_s25 = scalar_lea.vmem %s3366_s8, 1024  ;;  %p2581_p2 = scmp.lt.s32.totalorder %s3366_s8, %s2579_s19 }
 0x4ff   : > { %p2575_p6 = scmp.ne.s32.totalorder %s3366_s8, %s2574_s25  ;;  %p2582_p3 = scmp.lt.s32.totalorder %s2580_s20, %s2574_s25 }
 0x501   : > { %1382 = vperm.xlu1 %2489, %v2521_v28   ;;  %p2576_p10 = pnand %p2575_p6, %p3441_p9  ;;  %p2583_p4 = por %p2582_p3, %p2581_p2 }
 0x503   : > { %p2577_p12 = pneg %p2576_p10 }
 0x505   : > { %p2584_p7 = pnand %p2583_p4, %p2577_p12 }
 0x545   : > { %v1348_v58 = vpop.permute.xlu0 %1347 }
 0x546   : > { %v1353_v59 = vpop.permute.xlu1 %1352  ;;  %v3222_v61 = vmul.f32 %v2538_v60, %v1348_v58 }
 0x547   : > { %v3227_v63 = vmul.f32 %v2539_v62, %v1353_v59 }
 0x548   : > { %1502 = vmatmul.mubr.f32.vlgmr.msra.gmra.mrb[8].mxu0 %v3222_v61 }
 0x549   : > { %1507 = vmatprep.mubr.f32.mxu0 %v2653_v50  ;;  %2372 = vmatpush3.bf16.msra.mxu0 %v2371_v15  ;;  %v1581_v15 = vld [vmem:[#allocation2 + $0x78] sm:$0xff] }
 0x54a   : > { %v1358_v0 = vpop.permute.xlu1 %1357  ;;  %2374 = vmatprep.subr.bf16.mxu0 %v2373_v17  ;;  %v2399_v17 = vpack.c.bf16 %v1581_v15, %v1580_v56 }
 0x54b   : > { %v3232_v2 = vmul.f32 %v2540_v1, %v1358_v0 }
 0x54c   : > { %1508 = vmatmul.mubr.f32.gmra.mrb[10].mxu0 %v3227_v63  ;;  %2416 = vmatpush3.bf16.msra.mxu1 %v2399_v17 }
 0x54d   : > { %1513 = vmatprep.mubr.f32.mxu0 %v2653_v50  ;;  %2376 = vmatpush3.bf16.msra.mxu0 %v2375_v22 }
 0x54e   : > { %v1363_v3 = vpop.permute.xlu1 %1362  ;;  %2378 = vmatprep.subr.bf16.mxu0 %v2377_v23 }
 0x54f   : > { %v3237_v5 = vmul.f32 %v2541_v4, %v1363_v3 }
 0x550   : > { %1514 = vmatmul.mubr.f32.gmra.mrb[12].mxu0 %v3232_v2 }
 0x551   : > { %1519 = vmatprep.mubr.f32.mxu0 %v2653_v50  ;;  %2380 = vmatpush3.bf16.msra.mxu0 %v2379_v29 }
 0x552   : > { %v1368_v37 = vpop.permute.xlu1 %1367  ;;  %2382 = vmatprep.subr.bf16.mxu0 %v2381_v30 }
 0x553   : > { %v3242_v6 = vmul.f32 %v2542_v42, %v1368_v37 }
 0x554   : > { %1520 = vmatmul.mubr.f32.gmra.mrb[14].mxu0 %v3237_v5 }
 0x555   : > { %1525 = vmatprep.mubr.f32.mxu0 %v2653_v50  ;;  %2384 = vmatpush3.bf16.msra.mxu0 %v2383_v35 }
 0x556   : > { %2386 = vmatprep.subr.bf16.mxu0 %v2385_v36  ;;  %v1373_v43 = vpop.permute.xlu1 %1372 }
 0x557   : > { %v3247_v7 = vmul.f32 %v2543_v12, %v1373_v43 }
 0x558   : > { %1526 = vmatmul.mubr.f32.gmra.mrb[16].mxu0 %v3242_v6 }
 0x559   : > { %1531 = vmatprep.mubr.f32.mxu0 %v2653_v50  ;;  %2388 = vmatpush3.bf16.msra.mxu0 %v2387_v47 }
 0x55a   : > { %2390 = vmatprep.subr.bf16.mxu0 %v2389_v48 }
 0x55c   : > { %1532 = vmatmul.mubr.f32.gmra.mrb[18].mxu0 %v3247_v7 }
 0x55d   : > { %1537 = vmatprep.mubr.f32.mxu0 %v2653_v50  ;;  %2392 = vmatpush3.bf16.msra.mxu0 %v2391_v54 }
 0x55e   : > { %2394 = vmatprep.subr.bf16.mxu0 %v2393_v57 }
 0x561   : > { %2396 = vmatpush3.bf16.msra.mxu0 %v2395_v11 }
 0x562   : > { %2398 = vmatprep.subr.bf16.mxu0 %v2397_v14 }
 0x565   : > { %2400 = vmatpush3.bf16.msra.mxu0 %v2399_v17 }
 0x57c   : > { %v1378_v46 = vpop.permute.xlu1 %1377 }
 0x57d   : > { %v3252_v16 = vmul.f32 %v2544_v8, %v1378_v46 }
 0x57f   : > { %1538 = vmatmul.mubr.f32.gmra.mrb[20].mxu0 %v3252_v16 }
 0x580   : > { %v1383_v9 = vpop.permute.xlu1 %1382  ;;  %1543 = vmatprep.mubr.f32.mxu0 %v2653_v50  ;;  %v1427_v50 = vlaneseq }
 0x581   : > { %v3257_v28 = vmul.f32 %v2545_v52, %v1383_v9 }
 0x582   : > { %v1428_v18 = vshrl.u32 %v1427_v50, 7  ;;  %v1991_v50 = vld [vmem:[%s3422_s9] ss:$0 sm:$0xff] }
 0x583   : > { %1544 = vmatmul.mubr.f32.gmra.mrb[22].mxu0 %v3257_v28 }
 0x584   : > { %v1429_v19 = vsub.s32 0, %v1428_v18  ;;  %v1433_v21 = vsub.s32 1, %v1428_v18 }
 0x586   : > { %v1430_v22 = vrot.slane %v1425_v20, %v1429_v19  ;;  %v1434_v23 = vrot.slane %v1425_v20, %v1433_v21 }
 0x61b   : > { %v1503_v24 = vpop.f32.mrb[8].mxu0 }
 0x61c   : > { %v1504_v25 = vadd.f32 %v1503_v24, %v1430_v22  ;;  %v1505_v26 = vpop.f32.mrb[9].mxu0 }
 0x61d   : > { %v1506_v27 = vadd.f32 %v1505_v26, %v1434_v23 }
 0x61e   : > { %v1550_v31 = vmax.f32 %v1504_v25, 0.0 }
 0x61f   : > { %v1551_v29 = vmax.f32 %v1506_v27, 0.0  ;;  %v1509_v30 = vpop.f32.mrb[10].mxu0 }
 0x620   : > { %v1510_v32 = vadd.f32 %v1509_v30, %v1430_v22  ;;  %v1511_v33 = vpop.f32.mrb[11].mxu0 }
 0x621   : > { %v1512_v34 = vadd.f32 %v1511_v33, %v1434_v23  ;;  %1669 = vmatprep.mubr.f32.mxu0 %v1551_v29 }
 0x622   : > { %1670 = vmatmul.mubr.f32.vlgmr.msra.gmra.mrb[24].mxu0 %v1550_v31  ;;  %v1552_v38 = vmax.f32 %v1510_v32, 0.0 }
 0x623   : > { %v1553_v35 = vmax.f32 %v1512_v34, 0.0  ;;  %v1515_v36 = vpop.f32.mrb[12].mxu0 }
 0x624   : > { %v1516_v41 = vadd.f32 %v1515_v36, %v1430_v22  ;;  %v1517_v44 = vpop.f32.mrb[13].mxu0 }
 0x625   : > { %v1518_v45 = vadd.f32 %v1517_v44, %v1434_v23  ;;  %1674 = vmatprep.mubr.f32.mxu0 %v1553_v35 }
 0x626   : > { %1675 = vmatmul.mubr.f32.gmra.mrb[26].mxu0 %v1552_v38  ;;  %v1554_v39 = vmax.f32 %v1516_v41, 0.0 }
 0x627   : > { %v1555_v47 = vmax.f32 %v1518_v45, 0.0  ;;  %v1521_v48 = vpop.f32.mrb[14].mxu0 }
 0x628   : > { %v1522_v51 = vadd.f32 %v1521_v48, %v1430_v22  ;;  %v1523_v40 = vpop.f32.mrb[15].mxu0 }
 0x629   : > { %v1524_v53 = vadd.f32 %v1523_v40, %v1434_v23  ;;  %1679 = vmatprep.mubr.f32.mxu0 %v1555_v47 }
 0x62a   : > { %1680 = vmatmul.mubr.f32.gmra.mrb[28].mxu0 %v1554_v39  ;;  %v1556_v58 = vmax.f32 %v1522_v51, 0.0 }
 0x62b   : > { %v1557_v54 = vmax.f32 %v1524_v53, 0.0  ;;  %v1527_v57 = vpop.f32.mrb[16].mxu0 }
 0x62c   : > { %v1528_v59 = vadd.f32 %v1527_v57, %v1430_v22  ;;  %v1529_v60 = vpop.f32.mrb[17].mxu0 }
 0x62d   : > { %v1530_v62 = vadd.f32 %v1529_v60, %v1434_v23  ;;  %1684 = vmatprep.mubr.f32.mxu1 %v1557_v54 }
 0x62e   : > { %1685 = vmatmul.mubr.f32.vlgmr.msra.gmra.mrb[16].mxu1 %v1556_v58  ;;  %v1558_v3 = vmax.f32 %v1528_v59, 0.0 }
 0x62f   : > { %v1559_v0 = vmax.f32 %v1530_v62, 0.0  ;;  %v1533_v1 = vpop.f32.mrb[18].mxu0 }
 0x630   : > { %v1534_v4 = vadd.f32 %v1533_v1, %v1430_v22  ;;  %v1535_v37 = vpop.f32.mrb[19].mxu0 }
 0x631   : > { %v1536_v42 = vadd.f32 %v1535_v37, %v1434_v23  ;;  %1689 = vmatprep.mubr.f32.mxu1 %v1559_v0 }
 0x632   : > { %1690 = vmatmul.mubr.f32.gmra.mrb[18].mxu1 %v1558_v3  ;;  %v1560_v12 = vmax.f32 %v1534_v4, 0.0 }
 0x633   : > { %v1561_v43 = vmax.f32 %v1536_v42, 0.0 }
 0x635   : > { %1694 = vmatprep.mubr.f32.mxu1 %v1561_v43 }
 0x636   : > { %1695 = vmatmul.mubr.f32.gmra.mrb[20].mxu1 %v1560_v12 }
 0x652   : > { %v1539_v46 = vpop.f32.mrb[20].mxu0 }
 0x653   : > { %v1540_v8 = vadd.f32 %v1539_v46, %v1430_v22  ;;  %v1541_v9 = vpop.f32.mrb[21].mxu0 }
 0x654   : > { %v1542_v52 = vadd.f32 %v1541_v9, %v1434_v23 }
 0x655   : > { %v1562_v11 = vmax.f32 %v1540_v8, 0.0 }
 0x656   : > { %v1563_v55 = vmax.f32 %v1542_v52, 0.0  ;;  %v1545_v10 = vpop.f32.mrb[22].mxu0 }
 0x657   : > { %v1546_v49 = vadd.f32 %v1545_v10, %v1430_v22  ;;  %v1547_v13 = vpop.f32.mrb[23].mxu0 }
 0x658   : > { %v1548_v14 = vadd.f32 %v1547_v13, %v1434_v23  ;;  %1699 = vmatprep.mubr.f32.mxu1 %v1563_v55 }
 0x659   : > { %1700 = vmatmul.mubr.f32.gmra.mrb[22].mxu1 %v1562_v11  ;;  %v1564_v15 = vmax.f32 %v1546_v49, 0.0 }
 0x65a   : > { %v1565_v56 = vmax.f32 %v1548_v14, 0.0 }
 0x65c   : > { %1704 = vmatprep.mubr.f32.mxu1 %v1565_v56 }
 0x65d   : > { %1705 = vmatmul.mubr.f32.gmra.mrb[24].mxu1 %v1564_v15 }
 0x6f5   : > { %v2105_v17 = vpop.f32.mrb[24].mxu0 }
 0x6f6   : > { %v2106_v18 = vpop.f32.mrb[25].mxu0 }
 0x6f7   : > { %v2107_v19 = vadd.f32 %v2106_v18, %v2105_v17 }
 0x6f9   : > { %v1672_v20 = vadd.f32 %v2107_v19, %v1991_v50  ;;  %v2108_v21 = vpop.f32.mrb[26].mxu0 }
 0x6fa   : > { %v2109_v24 = vpop.f32.mrb[27].mxu0 }
 0x6fb   : > { %v2110_v25 = vadd.f32 %v2109_v24, %v2108_v21  ;;  %v3267_v22 = vadd.f32 %v1672_v20, %v3222_v61 }
 0x6fd   : > { %v1677_v23 = vadd.f32 %v2110_v25, %v1991_v50  ;;  %v2111_v26 = vpop.f32.mrb[28].mxu0  ;;  %1718 = vadd.xlane.f32.xlu1 %v3267_v22  ;;  %v1734_v27 = vmul.f32 %v3267_v22, %v3267_v22 }
 0x6fe   : > { %v2112_v29 = vpop.f32.mrb[29].mxu0 }
 0x6ff   : > { %v3273_v30 = vadd.f32 %v1677_v23, %v3227_v63  ;;  %v2113_v31 = vadd.f32 %v2112_v29, %v2111_v26  ;;  %1742 = vadd.xlane.f32.xlu0 %v1734_v27 }
 0x701   : > { %v1682_v32 = vadd.f32 %v2113_v31, %v1991_v50  ;;  %v2114_v33 = vpop.f32.mrb[16].mxu1  ;;  %v1735_v34 = vmul.f32 %v3273_v30, %v3273_v30 }
 0x702   : > { %v2115_v61 = vpop.f32.mrb[17].mxu1 }
 0x703   : > { %v2116_v35 = vadd.f32 %v2115_v61, %v2114_v33  ;;  %1744 = vadd.xlane.f32.xlu1 %v1735_v34  ;;  %1720 = vadd.xlane.f32.xlu0 %v3273_v30  ;;  %v3279_v41 = vadd.f32 %v1682_v32, %v3232_v2  ;;  %v3319_v32 = vld [vmem:[%s3423_s10] ss:$0 sm:$0xff] }
 0x705   : > { %v1687_v36 = vadd.f32 %v2116_v35, %v1991_v50  ;;  %v2117_v38 = vpop.f32.mrb[18].mxu1  ;;  %v1736_v39 = vmul.f32 %v3279_v41, %v3279_v41 }
 0x706   : > { %v2118_v44 = vpop.f32.mrb[19].mxu1 }
 0x707   : > { %v2119_v63 = vadd.f32 %v2118_v44, %v2117_v38  ;;  %1722 = vadd.xlane.f32.xlu0 %v3279_v41  ;;  %v3283_v45 = vadd.f32 %v1687_v36, %v3237_v5  ;;  %v3326_v38 = vld [vmem:[%s3424_s11] ss:$0 sm:$0xff] }
 0x709   : > { %v1692_v47 = vadd.f32 %v2119_v63, %v1991_v50  ;;  %v2120_v48 = vpop.f32.mrb[20].mxu1  ;;  %1724 = vadd.xlane.f32.xlu1 %v3283_v45  ;;  %v1737_v2 = vmul.f32 %v3283_v45, %v3283_v45 }
 0x70a   : > { %v2121_v51 = vpop.f32.mrb[21].mxu1 }
 0x70b   : > { %v2122_v40 = vadd.f32 %v2121_v51, %v2120_v48  ;;  %1746 = vadd.xlane.f32.xlu0 %v1736_v39  ;;  %v3291_v54 = vadd.f32 %v1692_v47, %v3242_v6 }
 0x70d   : > { %v1697_v53 = vadd.f32 %v2122_v40, %v1991_v50  ;;  %1748 = vadd.xlane.f32.xlu1 %v1737_v2  ;;  %v1738_v57 = vmul.f32 %v3291_v54, %v3291_v54 }
 0x70f   : > { %1726 = vadd.xlane.f32.xlu0 %v3291_v54  ;;  %v3295_v5 = vadd.f32 %v1697_v53, %v3247_v7 }
 0x711   : > { %1728 = vadd.xlane.f32.xlu1 %v3295_v5  ;;  %v1739_v58 = vmul.f32 %v3295_v5, %v3295_v5 }
 0x713   : > { %1750 = vadd.xlane.f32.xlu0 %v1738_v57 }
 0x715   : > { %1752 = vadd.xlane.f32.xlu1 %v1739_v58 }
 0x72c   : > { %v2123_v59 = vpop.f32.mrb[22].mxu1 }
 0x72d   : > { %v2124_v60 = vpop.f32.mrb[23].mxu1 }
 0x72e   : > { %v2125_v62 = vadd.f32 %v2124_v60, %v2123_v59 }
 0x730   : > { %v1702_v6 = vadd.f32 %v2125_v62, %v1991_v50  ;;  %v2126_v0 = vpop.f32.mrb[24].mxu1 }
 0x731   : > { %v2127_v1 = vpop.f32.mrb[25].mxu1 }
 0x732   : > { %v2128_v3 = vadd.f32 %v2127_v1, %v2126_v0  ;;  %v3303_v7 = vadd.f32 %v1702_v6, %v3252_v16 }
 0x734   : > { %v1707_v4 = vadd.f32 %v2128_v3, %v1991_v50  ;;  %1730 = vadd.xlane.f32.xlu0 %v3303_v7  ;;  %v1740_v42 = vmul.f32 %v3303_v7, %v3303_v7 }
 0x736   : > { %v3307_v37 = vadd.f32 %v1707_v4, %v3257_v28 }
 0x738   : > { %1732 = vadd.xlane.f32.xlu1 %v3307_v37  ;;  %1754 = vadd.xlane.f32.xlu0 %v1740_v42  ;;  %v1741_v43 = vmul.f32 %v3307_v37, %v3307_v37 }
 0x73c   : > { %1756 = vadd.xlane.f32.xlu1 %v1741_v43 }
 0x78a   : > { %v1719_v12 = vpop.xlane.xlu1 %1718 }
 0x78b   : > { %v1758_v46 = vmul.f32 0.0078125, %v1719_v12 }
 0x78c   : > { %v1743_v16 = vpop.xlane.xlu0 %1742 }
 0x78d   : > { %v1774_v8 = vmul.f32 %v1758_v46, %v1758_v46  ;;  %v1766_v9 = vmul.f32 0.0078125, %v1743_v16  ;;  %v1790_v27 = vsub.f32 %v3267_v22, %v1758_v46 }
 0x78f   : > { %v1782_v52 = vsub.f32 %v1766_v9, %v1774_v8 }
 0x790   : > { %v1745_v55 = vpop.xlane.xlu1 %1744  ;;  %v1721_v10 = vpop.xlane.xlu0 %1720 }
 0x791   : > { %v1798_v28 = vadd.f32 1e-05, %v1782_v52  ;;  %v1759_v11 = vmul.f32 0.0078125, %v1721_v10  ;;  %v1767_v49 = vmul.f32 0.0078125, %v1745_v55 }
 0x793   : > { %2522 = vrsqrt.f32 %v1798_v28  ;;  %v1775_v13 = vmul.f32 %v1759_v11, %v1759_v11  ;;  %v1791_v40 = vsub.f32 %v3273_v30, %v1759_v11 }
 0x794   : > { %v1723_v14 = vpop.xlane.xlu0 %1722 }
 0x795   : > { %v1783_v56 = vsub.f32 %v1767_v49, %v1775_v13  ;;  %v1760_v15 = vmul.f32 0.0078125, %v1723_v14 }
 0x796   : > { %v1725_v17 = vpop.xlane.xlu1 %1724 }
 0x797   : > { %v1799_v50 = vadd.f32 1e-05, %v1783_v56  ;;  %v1761_v18 = vmul.f32 0.0078125, %v1725_v17  ;;  %v1776_v20 = vmul.f32 %v1760_v15, %v1760_v15  ;;  %v1792_v3 = vsub.f32 %v3279_v41, %v1760_v15 }
 0x798   : > { %v1747_v19 = vpop.xlane.xlu0 %1746 }
 0x799   : > { %2524 = vrsqrt.f32 %v1799_v50  ;;  %v1768_v21 = vmul.f32 0.0078125, %v1747_v19  ;;  %v1777_v25 = vmul.f32 %v1761_v18, %v1761_v18  ;;  %v1793_v42 = vsub.f32 %v3283_v45, %v1761_v18 }
 0x79a   : > { %v1749_v24 = vpop.xlane.xlu1 %1748 }
 0x79b   : > { %v1784_v23 = vsub.f32 %v1768_v21, %v1776_v20  ;;  %v1769_v26 = vmul.f32 0.0078125, %v1749_v24 }
 0x79c   : > { %v1727_v29 = vpop.xlane.xlu0 %1726 }
 0x79d   : > { %v2523_v31 = vpop.eup %2522  ;;  %v1800_v33 = vadd.f32 1e-05, %v1784_v23  ;;  %v1785_v34 = vsub.f32 %v1769_v26, %v1777_v25  ;;  %v1762_v61 = vmul.f32 0.0078125, %v1727_v29 }
 0x79e   : > { %v1814_v35 = vmul.f32 %v2523_v31, %v1790_v27  ;;  %v1729_v36 = vpop.xlane.xlu1 %1728 }
 0x79f   : > { %2526 = vrsqrt.f32 %v1800_v33  ;;  %v1801_v22 = vadd.f32 1e-05, %v1785_v34  ;;  %v1763_v63 = vmul.f32 0.0078125, %v1729_v36  ;;  %v1778_v48 = vmul.f32 %v1762_v61, %v1762_v61 }
 0x7a0   : > { %v1829_v44 = vmul.f32 %v3319_v32, %v1814_v35  ;;  %v1751_v47 = vpop.xlane.xlu0 %1750  ;;  %v1794_v41 = vsub.f32 %v3291_v54, %v1762_v61 }
 0x7a1   : > { %2528 = vrsqrt.f32 %v1801_v22  ;;  %v1770_v39 = vmul.f32 0.0078125, %v1751_v47  ;;  %v1779_v57 = vmul.f32 %v1763_v63, %v1763_v63  ;;  %v1795_v45 = vsub.f32 %v3295_v5, %v1763_v63 }
 0x7a2   : > { %v1844_v51 = vadd.f32 %v3326_v38, %v1829_v44  ;;  %v1753_v2 = vpop.xlane.xlu1 %1752 }
 0x7a3   : > { %v2525_v53 = vpop.eup %2524  ;;  %v1786_v58 = vsub.f32 %v1770_v39, %v1778_v48  ;;  %v1771_v59 = vmul.f32 0.0078125, %v1753_v2 }
 0x7a4   : > { %1852 = vst [vmem:[%s3331_s30] sm:$0xff] %v1844_v51  ;;  %v1815_v60 = vmul.f32 %v2525_v53, %v1791_v40 }
 0x7a5   : > { %v1802_v62 = vadd.f32 1e-05, %v1786_v58  ;;  %v1787_v6 = vsub.f32 %v1771_v59, %v1779_v57 }
 0x7a6   : > { %v1830_v0 = vmul.f32 %v3319_v32, %v1815_v60 }
 0x7a7   : > { %2530 = vrsqrt.f32 %v1802_v62  ;;  %v1803_v1 = vadd.f32 1e-05, %v1787_v6 }
 0x7a8   : > { %v1845_v30 = vadd.f32 %v3326_v38, %v1830_v0 }
 0x7a9   : > { %v2527_v4 = vpop.eup %2526  ;;  %2532 = vrsqrt.f32 %v1803_v1 }
 0x7aa   : > { %1853 = vst [vmem:[%s3331_s30 + $0x8] sm:$0xff] %v1845_v30  ;;  %v1816_v43 = vmul.f32 %v2527_v4, %v1792_v3 }
 0x7ab   : > { %v2529_v12 = vpop.eup %2528 }
 0x7ac   : > { %v1831_v46 = vmul.f32 %v3319_v32, %v1816_v43  ;;  %v1817_v16 = vmul.f32 %v2529_v12, %v1793_v42 }
 0x7ae   : > { %v1846_v8 = vadd.f32 %v3326_v38, %v1831_v46  ;;  %v1832_v9 = vmul.f32 %v3319_v32, %v1817_v16 }
 0x7b0   : > { %1854 = vst [vmem:[%s3331_s30 + $0x10] sm:$0xff] %v1846_v8  ;;  %v1847_v52 = vadd.f32 %v3326_v38, %v1832_v9 }
 0x7b1   : > { %v2531_v55 = vpop.eup %2530 }
 0x7b2   : > { %1855 = vst [vmem:[%s3331_s30 + $0x18] sm:$0xff] %v1847_v52  ;;  %v1818_v10 = vmul.f32 %v2531_v55, %v1794_v41 }
 0x7b3   : > { %v2533_v28 = vpop.eup %2532 }
 0x7b4   : > { %v1833_v11 = vmul.f32 %v3319_v32, %v1818_v10  ;;  %v1819_v49 = vmul.f32 %v2533_v28, %v1795_v45 }
 0x7b6   : > { %v1848_v13 = vadd.f32 %v3326_v38, %v1833_v11  ;;  %v1834_v14 = vmul.f32 %v3319_v32, %v1819_v49 }
 0x7b8   : > { %1856 = vst [vmem:[%s3331_s30 + $0x20] sm:$0xff] %v1848_v13  ;;  %v1849_v56 = vadd.f32 %v3326_v38, %v1834_v14 }
 0x7ba   : > { %1857 = vst [vmem:[%s3331_s30 + $0x28] sm:$0xff] %v1849_v56 }
 0x7c1   : > { %v1731_v15 = vpop.xlane.xlu0 %1730 }
 0x7c2   : > { %v1764_v17 = vmul.f32 0.0078125, %v1731_v15 }
 0x7c4   : > { %v1780_v18 = vmul.f32 %v1764_v17, %v1764_v17  ;;  %v1796_v29 = vsub.f32 %v3303_v7, %v1764_v17 }
 0x7c5   : > { %v1733_v54 = vpop.xlane.xlu1 %1732  ;;  %v1755_v50 = vpop.xlane.xlu0 %1754 }
 0x7c6   : > { %v1765_v19 = vmul.f32 0.0078125, %v1733_v54  ;;  %v1772_v5 = vmul.f32 0.0078125, %v1755_v50 }
 0x7c8   : > { %v1788_v20 = vsub.f32 %v1772_v5, %v1780_v18  ;;  %v1781_v24 = vmul.f32 %v1765_v19, %v1765_v19  ;;  %v1797_v34 = vsub.f32 %v3307_v37, %v1765_v19 }
 0x7c9   : > { %v1757_v21 = vpop.xlane.xlu1 %1756 }
 0x7ca   : > { %v1804_v25 = vadd.f32 1e-05, %v1788_v20  ;;  %v1773_v23 = vmul.f32 0.0078125, %v1757_v21 }
 0x7cc   : > { %2534 = vrsqrt.f32 %v1804_v25  ;;  %v1789_v26 = vsub.f32 %v1773_v23, %v1781_v24 }
 0x7ce   : > { %v1805_v27 = vadd.f32 1e-05, %v1789_v26 }
 0x7d0   : > { %2536 = vrsqrt.f32 %v1805_v27 }
 0x7d6   : > { %v2535_v31 = vpop.eup %2534 }
 0x7d7   : > { %v1820_v33 = vmul.f32 %v2535_v31, %v1796_v29 }
 0x7d9   : > { %v1835_v61 = vmul.f32 %v3319_v32, %v1820_v33 }
 0x7da   : > { %v2537_v35 = vpop.eup %2536 }
 0x7db   : > { %v1850_v36 = vadd.f32 %v3326_v38, %v1835_v61  ;;  %v1821_v22 = vmul.f32 %v2537_v35, %v1797_v34 }
 0x7dd   : > { %1858 = vst [vmem:[%s3331_s30 + $0x30] sm:$0xff] %v1850_v36  ;;  %v1836_v44 = vmul.f32 %v3319_v32, %v1821_v22 }
 0x7df   : > { %v1851_v7 = vadd.f32 %v3326_v38, %v1836_v44 }
 0x7e1   : > { %1859 = vst [vmem:[%s3331_s30 + $0x38] sm:$0xff] %v1851_v7 }
 0x7e2   : > { %2587 = shalt.err (!%p2584_p7)
}
 0x7e3   : > { %s2588_s16 = scalar_lea.hbm %s3364_s18, 1024  ;;  %s2592_s29 = scalar_lea.hbm %s3425_s12, 2048 }
 0x7e4   : > { %p2589_p8 = scmp.ne.s32.totalorder %s3364_s18, %s2588_s16  ;;  %p2593_p1 = scmp.lt.u32.totalorder %s3364_s18, %s3425_s12 }
 0x7e5   : > { %p2594_p0 = scmp.lt.u32.totalorder %s2592_s29, %s2588_s16  ;;  %p2596_p6 = scmp.lt.u32.totalorder %s2588_s16, %s3364_s18 }
 0x7e6   : > { %p2590_p11 = pnand %p2589_p8, %p3441_p9 }
 0x7e7   : > { %p2595_p5 = por %p2594_p0, %p2593_p1 }
 0x7e8   : > { %p2591_p13 = pneg %p2590_p11 }
 0x7e9   : > { %p2597_p10 = por %p2596_p6, %p2595_p5 }
 0x7eb   : > { %p2598_p12 = pnand %p2597_p10, %p2591_p13 }
 0x7ed   : > { %2601 = shalt.err (!%p2598_p12)
}
 0x7ee   : > { %s2655_s25 = smov 128   ;;  %s2656_s15 = smov 8  }
 0x7ef   : > { %2429 = dma.vmem_to_hbm [thread:$0]  (%p3441_p9), %s3366_s8, 1024, %s3364_s18, %s3372_s17, %s2655_s25, %s2655_s25, %s2656_s15  }
 0x7f0 PF: > { %p2441_p2 = scmp.ge.s32.totalorder %s2640_s24, 2  ;;  %s1889_s19 = sand.u32 1, %s2628_s21  }
 0x7f1   : > { %p3442_p3 = scmp.ne.s32.totalorder %s3434_s14, 0  ;;  %s1890_s20 = scalar_lea.sflag [#allocation4], %s1889_s19 }
 0x7f3   : > { %p2436_p4 = pnand %p2441_p2, %p3442_p3 }
 0x7f5   : > { %2623 = dma.done.wait (!%p2436_p4), %s1890_s20, 1024  }
 0x7f6   : > { %2625 = vsyncadd (!%p2436_p4), %s1890_s20, 4294966272  ;;  %s3443_s16 = sld [smem:[#allocation8_spill]]  ;;  %s3444_s23 = sld [smem:[#allocation9_spill]] }
 0x7f7   : > { %p23_p7 = scmp.ge.s32.totalorder %s2747_s27, 4   ;;  %s3445_s21 = smov %s2632_s22 }
 0x7f8   : > { %s3447_s24 = smov %s2747_s27 }
 0x7f9   :  { %25 = sbr.rel (!%p23_p7) target bundleno = 6 (0x6), region = 108 }
 0x7fc   : > { %s3446_s22 = smov %s3443_s16 }
 0x800   :  { %1895 = vsyncpa [#allocation3], 1 }
 0x801   :  { %1897 = vsyncpa [#allocation3 + $0x1], 1 }
 0x802   :  { %1898 = vsyncpa [#allocation4], 1 }
 0x803   :  { %1900 = vsyncpa [#allocation4 + $0x1], 1 }

</bundles_post_ra>
